<compile_context>
chip_gen: v5e
topology: v5e:2x2
jax: 0.10.0
libtpu: 0.0.40
codegen_flags: <defaults>
</compile_context>

<pallas_src>
import functools

import jax
import jax.numpy as jnp
from jax import lax
from jax.experimental import pallas as pl
from jax.experimental.pallas import tpu as pltpu


def _round_up(x, m):
    return (x + m - 1) // m * m


# ------------------------------ kernel bodies --------------------------------


def _softmax_times_v(s, v_ref, o_ref):
    """Numerically stable softmax over keys, then p @ V (f32 accumulation)."""
    s = s - jnp.max(s, axis=-1, keepdims=True)
    p = jnp.exp(s)
    # Denominator reciprocal on the EUP slot; approx=True gives ~1e-3-level
    # relative error in the attention weights (use approx=False for bit parity).
    att = p * pl.reciprocal(jnp.sum(p, axis=-1, keepdims=True), approx=True)
    o_ref[...] = jnp.dot(att.astype(v_ref.dtype), v_ref[...],
                         preferred_element_type=jnp.float32).astype(o_ref.dtype)


def _resident_fold_kernel(x1_ref, m_ref, v_ref, o_ref):
    # dim <= dim_kq: scores come straight from the x1 tile.  M = scale*w_q@K^T
    # and V are precomputed once in the wrapper and stay VMEM-resident.
    s = jnp.dot(x1_ref[...], m_ref[...], preferred_element_type=jnp.float32)
    _softmax_times_v(s, v_ref, o_ref)


def _resident_proj_kernel(x1_ref, wq_ref, k_ref, v_ref, o_ref):
    # dim > dim_kq: keep the per-tile Q projection (not redundant work); the
    # softmax scale is folded into w_q wrapper-side.
    q = jnp.dot(x1_ref[...], wq_ref[...], preferred_element_type=jnp.float32)
    # Contract q and K on their last axes (no explicit k.T / XLU transpose).
    s = lax.dot_general(q.astype(k_ref.dtype), k_ref[...],
                        (((1,), (1,)), ((), ())),
                        preferred_element_type=jnp.float32)
    _softmax_times_v(s, v_ref, o_ref)


def _flash_kernel(lhs_ref, rhs_ref, v_ref, o_ref, m_sc, l_sc, acc_sc, *, s2, tk):
    """Online-softmax attention; kv is the innermost ("arbitrary") grid axis."""
    kv = pl.program_id(1)

    @pl.when(kv == 0)
    def _():
        m_sc[...] = jnp.full_like(m_sc, -jnp.inf)
        l_sc[...] = jnp.zeros_like(l_sc)
        acc_sc[...] = jnp.zeros_like(acc_sc)

    s = jnp.dot(lhs_ref[...], rhs_ref[...], preferred_element_type=jnp.float32)
    if s2 % tk != 0:  # static: mask the zero-padded key columns of the last block
        col = kv * tk + lax.broadcasted_iota(jnp.int32, s.shape, 1)
        s = jnp.where(col < s2, s, -jnp.inf)

    m_new = jnp.maximum(m_sc[...], jnp.max(s, axis=-1, keepdims=True))
    alpha = jnp.exp(m_sc[...] - m_new)
    p = jnp.exp(s - m_new)
    l_sc[...] = alpha * l_sc[...] + jnp.sum(p, axis=-1, keepdims=True)
    acc_sc[...] = alpha * acc_sc[...] + jnp.dot(
        p.astype(v_ref.dtype), v_ref[...], preferred_element_type=jnp.float32)
    m_sc[...] = m_new

    @pl.when(kv == pl.num_programs(1) - 1)
    def _():
        o_ref[...] = (acc_sc[...] *
                      pl.reciprocal(l_sc[...], approx=True)).astype(o_ref.dtype)


# --------------------------------- wrapper -----------------------------------


def cross_attention(x1, x2, w_q, w_k, w_v, *, tq=256, tk=512,
                    compute_dtype=jnp.bfloat16, use_flash=None):
    """Pallas implementation of CrossAttention.forward.

    compute_dtype: dtype of the MXU operands (bf16 by default; accumulation and
      softmax math stay f32).  Pass jnp.float32 for full reference parity.
    use_flash: None = auto (resident K/V for small S2, flash-style online
      softmax over a kv grid axis for large S2); True/False forces a path.
    """
    f32 = jnp.float32
    s1, dim = x1.shape
    s2, dim2 = x2.shape
    dim_kq = w_q.shape[1]
    dim_v = w_v.shape[1]
    assert dim2 == dim and w_k.shape == (dim, dim_kq) and w_v.shape == (dim, dim_v)

    scale = 1.0 / float(dim_kq) ** 0.5
    it = jnp.dtype(compute_dtype).itemsize
    out_it = jnp.dtype(x1.dtype).itemsize

    # ---- One-time precompute, hoisted out of the sequential grid loop. ------
    k = jnp.dot(x2.astype(f32), w_k.astype(f32))                       # [s2, dim_kq]
    v = jnp.dot(x2.astype(f32), w_v.astype(f32)).astype(compute_dtype)  # [s2, dim_v]

    fold_q = dim <= dim_kq
    if fold_q:
        # Fold Q projection + 1/sqrt(dim_kq) into M = scale * w_q @ K^T so the
        # per-tile score matmul contracts only `dim` (< dim_kq) terms.
        rhs = (scale * jnp.dot(w_q.astype(f32), k.T)).astype(compute_dtype)  # [dim, s2]
        lhs = x1.astype(compute_dtype)
    else:
        rhs = k.astype(compute_dtype)                                        # [s2, dim_kq]
        lhs = x1.astype(compute_dtype)
        wq_s = (scale * w_q.astype(f32)).astype(compute_dtype)               # [dim, dim_kq]
    d_lhs = lhs.shape[1]

    # Query tile: multiple of 8 sublanes; partial last block handled by Pallas
    # (no wrapper-side jnp.pad of x1 -> no extra HBM pass over x1).
    tq = max(8, min(tq, _round_up(s1, 8)))
    n_q = pl.cdiv(s1, tq)

    # Resident-path VMEM estimate (compute-dtype operands, f32 intermediates).
    resident_est = (2 * tq * d_lhs * it                      # lhs tiles (double buffered)
                    + (rhs.size + v.size) * it               # resident rhs + V (single)
                    + (0 if fold_q else dim * dim_kq * it)   # resident w_q
                    + 2 * tq * dim_v * out_it                # output tiles
                    + 3 * tq * s2 * 4)                       # score/p/att f32 temps
    if use_flash is None:
        # Resident K/V + full tq x s2 scores stop fitting comfortably on v7x
        # (64 MiB physical, 32 MiB scoped default) -> switch to flash.
        use_flash = resident_est > 24 * 2**20

    # ----------------------- resident-K/V path -------------------------------
    if not use_flash:
        vmem_limit = int(min(56 * 2**20, max(32 * 2**20, 2 * resident_est)))

        def _call_resident(single_buffer):
            # Resident operands have constant index_maps and are never
            # re-fetched -> single-buffer them to halve their VMEM footprint.
            res_kw = {"pipeline_mode": pl.Buffered(1)} if single_buffer else {}
            lhs_spec = pl.BlockSpec((tq, d_lhs), lambda i: (i, 0))
            if fold_q:
                kernel = _resident_fold_kernel
                in_specs = [lhs_spec,
                            pl.BlockSpec((d_lhs, s2), lambda i: (0, 0), **res_kw),
                            pl.BlockSpec((s2, dim_v), lambda i: (0, 0), **res_kw)]
                args = (lhs, rhs, v)
            else:
                kernel = _resident_proj_kernel
                in_specs = [lhs_spec,
                            pl.BlockSpec((dim, dim_kq), lambda i: (0, 0), **res_kw),
                            pl.BlockSpec((s2, dim_kq), lambda i: (0, 0), **res_kw),
                            pl.BlockSpec((s2, dim_v), lambda i: (0, 0), **res_kw)]
                args = (lhs, wq_s, rhs, v)
            return pl.pallas_call(
                kernel,
                out_shape=jax.ShapeDtypeStruct((s1, dim_v), x1.dtype),
                grid=(n_q,),
                in_specs=in_specs,
                # TODO(synk): dim_v < 128 keeps output stores lane-masked
                # (vst.msk); a lane-dense output needs a multi-head/batched API.
                out_specs=pl.BlockSpec((tq, dim_v), lambda i: (i, 0)),
                compiler_params=pltpu.CompilerParams(
                    dimension_semantics=("parallel",),
                    vmem_limit_bytes=vmem_limit),
            )(*args)

        try:
            return _call_resident(True)
        except Exception:
            # pl.Buffered(1) (single-buffered resident operands) unsupported on
            # this JAX version -> fall back to default double-buffering.
            return _call_resident(False)

    # ----------------- flash path: kv grid axis + online softmax -------------
    if not fold_q:
        # One-time wrapper-side Q projection (scale folded in) so nothing is
        # recomputed per kv step; keys go in as K^T so the kernel's score
        # matmul is a plain lhs @ rhs.
        lhs = jnp.dot(x1.astype(f32), w_q.astype(f32) * scale).astype(compute_dtype)
        rhs = k.T.astype(compute_dtype)                                  # [dim_kq, s2]
        d_lhs = dim_kq

    tk = max(128, (min(tk, _round_up(s2, 128)) // 128) * 128)
    s2_pad = _round_up(s2, tk)
    if s2_pad != s2:
        # Zero-pad the (small, precomputed) key-side operands along s2; padded
        # key columns are masked to -inf in-kernel.  x1 is never padded.
        rhs = jnp.pad(rhs, ((0, 0), (0, s2_pad - s2)))
        v = jnp.pad(v, ((0, s2_pad - s2), (0, 0)))

    flash_est = ((2 * tq * d_lhs + 2 * d_lhs * tk + 2 * tk * dim_v) * it
                 + 2 * tq * dim_v * out_it
                 + tq * (dim_v + 2) * 4        # m/l/acc scratch
                 + 3 * tq * tk * 4)            # score/p f32 temps
    vmem_limit = int(min(56 * 2**20, max(32 * 2**20, 2 * flash_est)))

    return pl.pallas_call(
        functools.partial(_flash_kernel, s2=s2, tk=tk),
        out_shape=jax.ShapeDtypeStruct((s1, dim_v), x1.dtype),
        grid=(n_q, s2_pad // tk),
        in_specs=[
            pl.BlockSpec((tq, d_lhs), lambda i, j: (i, 0)),
            pl.BlockSpec((d_lhs, tk), lambda i, j: (0, j)),
            pl.BlockSpec((tk, dim_v), lambda i, j: (j, 0)),
        ],
        out_specs=pl.BlockSpec((tq, dim_v), lambda i, j: (i, 0)),
        scratch_shapes=[pltpu.VMEM((tq, 1), jnp.float32),
                        pltpu.VMEM((tq, 1), jnp.float32),
                        pltpu.VMEM((tq, dim_v), jnp.float32)],
        compiler_params=pltpu.CompilerParams(
            dimension_semantics=("parallel", "arbitrary"),
            vmem_limit_bytes=vmem_limit),
    )(lhs, rhs, v)


# ------------------------------- references ----------------------------------


def cross_attention_ref(x1, x2, w_q, w_k, w_v):
    """Pure-JAX f32 reference mirroring the PyTorch forward."""
    q = x1 @ w_q
    k = x2 @ w_k
    v = x2 @ w_v
    att_s = q @ k.T
    att_w = jax.nn.softmax(att_s / (w_q.shape[1] ** 0.5), axis=-1)
    return att_w @ v


def _matched_bf16_ref(x1, x2, w_q, w_k, w_v, compute_dtype=jnp.bfloat16):
    """Reference applying the same compute-dtype operand casts as the kernel
    (folded-Q path, f32 softmax) -- used to validate the bf16 configuration."""
    f32 = jnp.float32
    scale = 1.0 / float(w_q.shape[1]) ** 0.5
    k = x2.astype(f32) @ w_k.astype(f32)
    v = (x2.astype(f32) @ w_v.astype(f32)).astype(compute_dtype)
    m = (scale * (w_q.astype(f32) @ k.T)).astype(compute_dtype)
    s = jnp.dot(x1.astype(compute_dtype), m, preferred_element_type=f32)
    p = jax.nn.softmax(s, axis=-1)
    return jnp.dot(p.astype(compute_dtype), v,
                   preferred_element_type=f32).astype(x1.dtype)


# ---------------------------------- demo --------------------------------------


if __name__ == "__main__":
    def make_inputs(key, dim, dim_kq, dim_v, s1, s2):
        k1, k2, k3, k4, k5 = jax.random.split(key, 5)
        x1 = jax.random.normal(k1, (s1, dim), jnp.float32)
        x2 = jax.random.normal(k2, (s2, dim), jnp.float32)
        # Parameters: torch.rand -> uniform [0, 1), deterministic.
        w_q = jax.random.uniform(k3, (dim, dim_kq), dtype=jnp.float32)
        w_k = jax.random.uniform(k4, (dim, dim_kq), dtype=jnp.float32)
        w_v = jax.random.uniform(k5, (dim, dim_v), dtype=jnp.float32)
        return x1, x2, w_q, w_k, w_v

    def check(name, out, ref, atol, rtol):
        out = jax.block_until_ready(out)
        assert out.shape == ref.shape, (name, out.shape, ref.shape)
        assert jnp.allclose(out, ref, atol=atol, rtol=rtol), (
            name, float(jnp.max(jnp.abs(out - ref))))

    keys = jax.random.split(jax.random.PRNGKey(0), 3)

    # 1) f32, resident folded-Q path (dim < dim_kq), multi-step query grid with
    #    a partial last block (s1=200, tq=128) -- module-parity check.
    args = make_inputs(keys[0], 32, 64, 64, 200, 64)
    ref = cross_attention_ref(*args)
    out = cross_attention(*args, tq=128, compute_dtype=jnp.float32)
    check("resident_f32", out, ref, 5e-3, 5e-3)

    # 2) Default config (bf16 MXU operands, tq=256) -- checked against a JAX
    #    reference applying the same bf16 casts (softmax kept in f32).
    out = cross_attention(*args)
    check("resident_bf16", out, _matched_bf16_ref(*args), 2e-2, 2e-2)

    # 3) f32 flash path (kv grid axis + online softmax); s2 not a multiple of
    #    the kv tile, exercising the pad+mask path.
    args3 = make_inputs(keys[1], 32, 64, 64, 200, 640)
    ref3 = cross_attention_ref(*args3)
    out3 = cross_attention(*args3, tq=128, tk=256, compute_dtype=jnp.float32,
                           use_flash=True)
    check("flash_f32", out3, ref3, 5e-3, 5e-3)

    # 4) f32 resident path with the in-kernel Q projection (dim > dim_kq).
    args4 = make_inputs(keys[2], 128, 64, 64, 200, 64)
    ref4 = cross_attention_ref(*args4)
    out4 = cross_attention(*args4, compute_dtype=jnp.float32)
    check("resident_proj_f32", out4, ref4, 5e-3, 5e-3)

    print("KERNEL_OK")
</pallas_src>

<mosaic_0001>
module attributes {stable_mosaic.version = 11 : i64} {
  func.func @_resident_fold_kernel(%arg0: i32, %arg1: memref<128x32xf32, #tpu.memory_space<vmem>>, %arg2: memref<32x64xf32, #tpu.memory_space<vmem>>, %arg3: memref<64x64xf32, #tpu.memory_space<vmem>>, %arg4: memref<128x64xf32, #tpu.memory_space<vmem>>) attributes {dimension_semantics = [#tpu.dimension_semantics<parallel>], iteration_bounds = array<i64: 2>, scalar_prefetch = 0 : i64, scratch_operands = 0 : i64, tpu.core_type = #tpu.core_type<tc>, window_params = [{transform_indices = @transform_0, window_bounds = array<i64: 128, 32>}, {pipeline_mode = #tpu.pipeline_mode<synchronous>, transform_indices = @transform_1, window_bounds = array<i64: 32, 64>}, {pipeline_mode = #tpu.pipeline_mode<synchronous>, transform_indices = @transform_2, window_bounds = array<i64: 64, 64>}, {transform_indices = @transform_3, window_bounds = array<i64: 128, 64>}]} {
    %c0 = arith.constant 0 : index
    %c0_0 = arith.constant 0 : index
    %0 = vector.load %arg1[%c0, %c0_0] : memref<128x32xf32, #tpu.memory_space<vmem>>, vector<128x32xf32>
    %c0_1 = arith.constant 0 : index
    %c0_2 = arith.constant 0 : index
    %1 = vector.load %arg2[%c0_1, %c0_2] : memref<32x64xf32, #tpu.memory_space<vmem>>, vector<32x64xf32>
    %cst = arith.constant dense<0.000000e+00> : vector<128x64xf32>
    %2 = tpu.matmul %0, %1, %cst {dimension_numbers = #tpu.dot_dimension_numbers<[1], [0], [0], [1], [0, 0, 1, 1], [], []>} : vector<128x32xf32>, vector<32x64xf32>, vector<128x64xf32> -> vector<128x64xf32>
    %cst_3 = arith.constant dense<0xFF800000> : vector<128xf32>
    %3 = vector.multi_reduction <maximumf>, %2, %cst_3 [1] : vector<128x64xf32> to vector<128xf32>
    %4 = vector.shape_cast %3 : vector<128xf32> to vector<128x1xf32>
    %5 = vector.broadcast %4 : vector<128x1xf32> to vector<128x64xf32>
    %6 = arith.subf %2, %5 : vector<128x64xf32>
    %7 = math.exp %6 : vector<128x64xf32>
    %cst_4 = arith.constant dense<0.000000e+00> : vector<128xf32>
    %8 = vector.multi_reduction <add>, %7, %cst_4 [1] : vector<128x64xf32> to vector<128xf32>
    %9 = vector.shape_cast %8 : vector<128xf32> to vector<128x1xf32>
    %10 = tpu.reciprocal %9 {approx = true} : vector<128x1xf32> -> vector<128x1xf32>
    %11 = vector.broadcast %10 : vector<128x1xf32> to vector<128x64xf32>
    %12 = arith.mulf %7, %11 : vector<128x64xf32>
    %c0_5 = arith.constant 0 : index
    %c0_6 = arith.constant 0 : index
    %13 = vector.load %arg3[%c0_5, %c0_6] : memref<64x64xf32, #tpu.memory_space<vmem>>, vector<64x64xf32>
    %cst_7 = arith.constant dense<0.000000e+00> : vector<128x64xf32>
    %14 = tpu.matmul %12, %13, %cst_7 {dimension_numbers = #tpu.dot_dimension_numbers<[1], [0], [0], [1], [0, 0, 1, 1], [], []>} : vector<128x64xf32>, vector<64x64xf32>, vector<128x64xf32> -> vector<128x64xf32>
    %c0_8 = arith.constant 0 : index
    %c0_9 = arith.constant 0 : index
    %15 = vector.load %arg4[%c0_8, %c0_9] : memref<128x64xf32, #tpu.memory_space<vmem>>, vector<128x64xf32>
    tpu.vector_store %arg4[%c0_8, %c0_9], %14 {strides = array<i32>} : memref<128x64xf32, #tpu.memory_space<vmem>>, vector<128x64xf32>,
    return
  }
  func.func @transform_0(%arg0: i32) -> (i32, i32) {
    %c0_i32 = arith.constant 0 : i32
    %c0_i32_0 = arith.constant 0 : i32
    return %arg0, %c0_i32 : i32, i32
  }
  func.func @transform_1(%arg0: i32) -> (i32, i32) {
    %c0_i32 = arith.constant 0 : i32
    %c0_i32_0 = arith.constant 0 : i32
    %c0_i32_1 = arith.constant 0 : i32
    return %c0_i32, %c0_i32_0 : i32, i32
  }
  func.func @transform_2(%arg0: i32) -> (i32, i32) {
    %c0_i32 = arith.constant 0 : i32
    %c0_i32_0 = arith.constant 0 : i32
    %c0_i32_1 = arith.constant 0 : i32
    return %c0_i32, %c0_i32_0 : i32, i32
  }
  func.func @transform_3(%arg0: i32) -> (i32, i32) {
    %c0_i32 = arith.constant 0 : i32
    %c0_i32_0 = arith.constant 0 : i32
    return %arg0, %c0_i32 : i32, i32
  }
}

module attributes {stable_mosaic.version = 11 : i64} {
  func.func @_resident_fold_kernel(%arg0: i32, %arg1: memref<128x32xf32, #tpu.memory_space<vmem>>, %arg2: memref<32x64xf32, #tpu.memory_space<vmem>>, %arg3: memref<64x64xf32, #tpu.memory_space<vmem>>, %arg4: memref<128x64xf32, #tpu.memory_space<vmem>>) attributes {dimension_semantics = [#tpu.dimension_semantics<parallel>], iteration_bounds = array<i64: 2>, scalar_prefetch = 0 : i64, scratch_operands = 0 : i64, tpu.core_type = #tpu.core_type<tc>, window_params = [{transform_indices = @transform_0, window_bounds = array<i64: 128, 32>}, {pipeline_mode = #tpu.pipeline_mode<synchronous>, transform_indices = @transform_1, window_bounds = array<i64: 32, 64>}, {pipeline_mode = #tpu.pipeline_mode<synchronous>, transform_indices = @transform_2, window_bounds = array<i64: 64, 64>}, {transform_indices = @transform_3, window_bounds = array<i64: 128, 64>}]} {
    %c0 = arith.constant 0 : index
    %c0_0 = arith.constant 0 : index
    %0 = vector.load %arg1[%c0, %c0_0] : memref<128x32xf32, #tpu.memory_space<vmem>>, vector<128x32xf32>
    %c0_1 = arith.constant 0 : index
    %c0_2 = arith.constant 0 : index
    %1 = vector.load %arg2[%c0_1, %c0_2] : memref<32x64xf32, #tpu.memory_space<vmem>>, vector<32x64xf32>
    %cst = arith.constant dense<0.000000e+00> : vector<128x64xf32>
    %2 = tpu.matmul %0, %1, %cst {dimension_numbers = #tpu.dot_dimension_numbers<[1], [0], [0], [1], [0, 0, 1, 1], [], []>} : vector<128x32xf32>, vector<32x64xf32>, vector<128x64xf32> -> vector<128x64xf32>
    %cst_3 = arith.constant dense<0xFF800000> : vector<128xf32>
    %3 = vector.multi_reduction <maximumf>, %2, %cst_3 [1] : vector<128x64xf32> to vector<128xf32>
    %4 = vector.shape_cast %3 : vector<128xf32> to vector<128x1xf32>
    %5 = vector.broadcast %4 : vector<128x1xf32> to vector<128x64xf32>
    %6 = arith.subf %2, %5 : vector<128x64xf32>
    %7 = math.exp %6 : vector<128x64xf32>
    %cst_4 = arith.constant dense<0.000000e+00> : vector<128xf32>
    %8 = vector.multi_reduction <add>, %7, %cst_4 [1] : vector<128x64xf32> to vector<128xf32>
    %9 = vector.shape_cast %8 : vector<128xf32> to vector<128x1xf32>
    %10 = tpu.reciprocal %9 {approx = true} : vector<128x1xf32> -> vector<128x1xf32>
    %11 = vector.broadcast %10 : vector<128x1xf32> to vector<128x64xf32>
    %12 = arith.mulf %7, %11 : vector<128x64xf32>
    %c0_5 = arith.constant 0 : index
    %c0_6 = arith.constant 0 : index
    %13 = vector.load %arg3[%c0_5, %c0_6] : memref<64x64xf32, #tpu.memory_space<vmem>>, vector<64x64xf32>
    %cst_7 = arith.constant dense<0.000000e+00> : vector<128x64xf32>
    %14 = tpu.matmul %12, %13, %cst_7 {dimension_numbers = #tpu.dot_dimension_numbers<[1], [0], [0], [1], [0, 0, 1, 1], [], []>} : vector<128x64xf32>, vector<64x64xf32>, vector<128x64xf32> -> vector<128x64xf32>
    %c0_8 = arith.constant 0 : index
    %c0_9 = arith.constant 0 : index
    %15 = vector.load %arg4[%c0_8, %c0_9] : memref<128x64xf32, #tpu.memory_space<vmem>>, vector<128x64xf32>
    tpu.vector_store %arg4[%c0_8, %c0_9], %14 {strides = array<i32>} : memref<128x64xf32, #tpu.memory_space<vmem>>, vector<128x64xf32>,
    return
  }
  func.func @transform_0(%arg0: i32) -> (i32, i32) {
    %c0_i32 = arith.constant 0 : i32
    %c0_i32_0 = arith.constant 0 : i32
    return %arg0, %c0_i32 : i32, i32
  }
  func.func @transform_1(%arg0: i32) -> (i32, i32) {
    %c0_i32 = arith.constant 0 : i32
    %c0_i32_0 = arith.constant 0 : i32
    %c0_i32_1 = arith.constant 0 : i32
    return %c0_i32, %c0_i32_0 : i32, i32
  }
  func.func @transform_2(%arg0: i32) -> (i32, i32) {
    %c0_i32 = arith.constant 0 : i32
    %c0_i32_0 = arith.constant 0 : i32
    %c0_i32_1 = arith.constant 0 : i32
    return %c0_i32, %c0_i32_0 : i32, i32
  }
  func.func @transform_3(%arg0: i32) -> (i32, i32) {
    %c0_i32 = arith.constant 0 : i32
    %c0_i32_0 = arith.constant 0 : i32
    return %arg0, %c0_i32 : i32, i32
  }
}

</mosaic_0001>

<bundles_post_ra>
// kernel: tpu_custom_call.1
= control target key start
LH: loop header
LB: loop body
LE: loop exit
PB: predicated region body
PF: predicated region fallthrough
CT: control target
= control target key end

     0   :  { %s1247_s12 = smov 0   ;;  %s1249_s13 = smov 0   ;;  %s1652_s0 = inlined_call_operand.vmem [shape: f32[200,32], index: 0, kind: input, shape index: {}]   ;;  %s1653_s1 = inlined_call_operand.vmem [shape: f32[32,64], index: 1, kind: input, shape index: {}]   ;;  %s1654_s2 = inlined_call_operand.vmem [shape: f32[64,64], index: 2, kind: input, shape index: {}]   ;;  %s1655_s3 = inlined_call_operand.vmem [shape: f32[200,64], index: 3, kind: output, shape index: {}]  }
   0x1   :  { %s1251_s14 = smov 0  }
   0x2 LB: > { %s1260_s15 = sadd.s32 4294967295, %s1193_s14   ;;  %s1262_s16 = sadd.s32 1, %s1193_s14   ;;  %s1193_s14 = sphi %s1251_s14, %s1664_s14   ;;  %s1189_s13 = sphi %s1249_s13, %s1663_s13   ;;  %s1185_s12 = sphi %s1247_s12, %s1662_s12  }
   0x3   : > { %s85_s17 = ssub.s32 %s1193_s14, %s1262_s16  ;;  %s88_s18 = sadd.s32 1, %s1189_s13 }
   0x4   : > { %p86_p0 = scmp.eq.s32.totalorder %s85_s17, 0  ;;  %p98_p1 = scmp.ne.s32.totalorder %s1189_s13, %s1185_s12 }
   0x5   : > { %p99_p2 = scmp.eq.s32.totalorder %s1260_s15, 1  ;;  %p919_p3 = scmp.ge.s32.totalorder %s1193_s14, 1 }
   0x6   : > { %s1270_s19 = scalar_select %p86_p0, %s1189_s13, %s88_s18  }
   0x7   : > { %p1272_p4 = por %p99_p2, %p98_p1  ;;  %p146_p5 = scmp.lt.s32.totalorder %s1193_s14, 3 }
   0x9   : > { %p147_p6 = pnand %p919_p3, %p146_p5 }
   0xa   : > { %s1283_s25 = sshll.u32 (!%p147_p6), %s1260_s15, 4 }
   0xb   : > { %150 = sbr.rel (%p147_p6) target bundleno = 707 (0x2c3), region = 32  ;;  %p178_p7 = scmp.lt.s32.totalorder (!%p147_p6), %s1283_s25, 24 }
  0x10   : > { %v211_v0 = vld [vmem:[%s1653_s1 + $0x18] sm:$0xff]  ;;  %v210_v1 = vld [vmem:[%s1653_s1 + $0x10] sm:$0xff]  ;;  %v209_v2 = vld [vmem:[%s1653_s1 + $0x8] sm:$0xff]  ;;  %s179_s28 = scalar_select %p178_p7, %s1283_s25, 24  ;;  %vm212_vm0 = vcmask 261120   ;;  %vm326_vm1 = vcmask 523264  }
  0x11   : > { %273 = vmatpush.msra.mxu0 %v211_v0  ;;  %975 = vmatpush.msra.mxu3 %v211_v0  ;;  %v208_v3 = vld [vmem:[%s1653_s1] sm:$0xff] }
  0x12   : > { %s922_s4 = sshll.u32 %s179_s28, 3 }
  0x13   : > { %274 = vmatpush.msra.mxu0 %v210_v1  ;;  %976 = vmatpush.msra.mxu3 %v210_v1  ;;  %s1296_s7 = scalar_lea.vmem %s1652_s0, %s922_s4  ;;  %s170_s4 = sand.u32 1, %s1185_s12  }
  0x14   : > { %v192_v4 = vld [vmem:[%s1296_s7] sm:$0xff]  ;;  %v201_v5 = vld [vmem:[%s1296_s7 + $0x48] sm:$0xff]  ;;  %v202_v7 = vld [vmem:[%s1296_s7 + $0x50] sm:$0xff]  ;;  %s920_s5 = sshll.u32 %s170_s4, 7  ;;  %s648_s12 = ssub.s32 (%p1272_p4), 25, %s1283_s25 }
  0x15   : > { %275 = vmatpush.msra.mxu0 %v209_v2  ;;  %977 = vmatpush.msra.mxu3 %v209_v2  ;;  %v193_v6 = vld [vmem:[%s1296_s7 + $0x8] sm:$0xff]  ;;  %v194_v8 = vld [vmem:[%s1296_s7 + $0x10] sm:$0xff]  ;;  %v203_v9 = vld [vmem:[%s1296_s7 + $0x58] sm:$0xff]  ;;  %s1514_s6 = scalar_lea.vmem [#allocation2], %s920_s5   ;;  %p649_p8 = scmp.lt.s32.totalorder (%p1272_p4), %s648_s12, 16 }
  0x16   : > { %v195_v10 = vld [vmem:[%s1296_s7 + $0x18] sm:$0xff]  ;;  %v204_v11 = vld [vmem:[%s1296_s7 + $0x60] sm:$0xff]  ;;  %v205_v13 = vld [vmem:[%s1296_s7 + $0x68] sm:$0xff] }
  0x17   : > { %276 = vmatpush.msra.mxu0 %v208_v3  ;;  %978 = vmatpush.msra.mxu3 %v208_v3  ;;  %v196_v12 = vld [vmem:[%s1296_s7 + $0x20] sm:$0xff]  ;;  %v197_v14 = vld [vmem:[%s1296_s7 + $0x28] sm:$0xff]  ;;  %v206_v15 = vld [vmem:[%s1296_s7 + $0x70] sm:$0xff] }
  0x18   : > { %923 = vmatmul.msk.f32.vlgmr.msra.gmra.mxu0 %vm212_vm0, %v192_v4  ;;  %932 = vmatmul.msk.f32.vlgmr.msra.gmra.mxu3 %vm212_vm0, %v201_v5  ;;  %v198_v16 = vld [vmem:[%s1296_s7 + $0x30] sm:$0xff]  ;;  %v207_v17 = vld [vmem:[%s1296_s7 + $0x78] sm:$0xff]  ;;  %v200_v19 = vld [vmem:[%s1296_s7 + $0x40] sm:$0xff] }
  0x19   : > { %v199_v18 = vld [vmem:[%s1296_s7 + $0x38] sm:$0xff]  ;;  %s972_s7 = sshll.u32 (%p1272_p4), %s1260_s15, 7 }
  0x1a   : > { %s1555_s10 = scalar_lea.vmem (%p1272_p4), %s1655_s3, %s972_s7  }
  0x20   : > { %924 = vmatmul.msk.f32.gmra.mxu0 %vm212_vm0, %v193_v6  ;;  %933 = vmatmul.msk.f32.gmra.mxu3 %vm212_vm0, %v202_v7 }
  0x28   : > { %925 = vmatmul.msk.f32.gmra.mxu0 %vm212_vm0, %v194_v8  ;;  %934 = vmatmul.msk.f32.gmra.mxu3 %vm212_vm0, %v203_v9 }
  0x30   : > { %926 = vmatmul.msk.f32.gmra.mxu0 %vm212_vm0, %v195_v10  ;;  %935 = vmatmul.msk.f32.gmra.mxu3 %vm212_vm0, %v204_v11 }
  0x38   : > { %927 = vmatmul.msk.f32.gmra.mxu0 %vm212_vm0, %v196_v12  ;;  %936 = vmatmul.msk.f32.gmra.mxu3 %vm212_vm0, %v205_v13 }
  0x40   : > { %928 = vmatmul.msk.f32.gmra.mxu0 %vm212_vm0, %v197_v14  ;;  %937 = vmatmul.msk.f32.gmra.mxu3 %vm212_vm0, %v206_v15 }
  0x48   : > { %929 = vmatmul.msk.f32.gmra.mxu0 %vm212_vm0, %v198_v16  ;;  %938 = vmatmul.msk.f32.gmra.mxu3 %vm212_vm0, %v207_v17 }
  0x50   : > { %930 = vmatmul.msk.f32.gmra.mxu0 %vm212_vm0, %v199_v18 }
  0x58   : > { %931 = vmatmul.msk.f32.gmra.mxu0 %vm212_vm0, %v200_v19 }
  0x95   : > { %v1330_v20 = vpop.f32.mrf.mxu0 }
  0x96   : > { %v327_v44 = vsel %vm326_vm1, %v1330_v20, -inf }
  0x9b   : > { %v305_v21 = vpop.f32.mrf.mxu3 }
  0x9c   : > { %v354_v22 = vsel %vm326_vm1, %v305_v21, -inf }
  0x9d   : > { %355 = vmax.xlane.f32.xlu1 %v354_v22  ;;  %v1333_v23 = vpop.f32.mrf.mxu0 }
  0x9e   : > { %v330_v26 = vsel %vm326_vm1, %v1333_v23, -inf }
  0xa3   : > { %v308_v24 = vpop.f32.mrf.mxu3 }
  0xa4   : > { %v357_v25 = vsel %vm326_vm1, %v308_v24, -inf }
  0xa5   : > { %358 = vmax.xlane.f32.xlu2 %v357_v25  ;;  %331 = vmax.xlane.f32.xlu1 %v330_v26  ;;  %v284_v27 = vpop.f32.mrf.mxu0 }
  0xa6   : > { %v333_v29 = vsel %vm326_vm1, %v284_v27, -inf }
  0xab   : > { %v1338_v28 = vpop.f32.mrf.mxu3 }
  0xac   : > { %v360_v45 = vsel %vm326_vm1, %v1338_v28, -inf }
  0xad   : > { %334 = vmax.xlane.f32.xlu2 %v333_v29  ;;  %v287_v30 = vpop.f32.mrf.mxu0 }
  0xae   : > { %v336_v31 = vsel %vm326_vm1, %v287_v30, -inf }
  0xaf   : > { %337 = vmax.xlane.f32.xlu1 %v336_v31 }
  0xb3   : > { %v314_v32 = vpop.f32.mrf.mxu3 }
  0xb4   : > { %v363_v33 = vsel %vm326_vm1, %v314_v32, -inf }
  0xb5   : > { %364 = vmax.xlane.f32.xlu2 %v363_v33  ;;  %v1343_v34 = vpop.f32.mrf.mxu0 }
  0xb6   : > { %v339_v46 = vsel %vm326_vm1, %v1343_v34, -inf }
  0xbb   : > { %v1345_v35 = vpop.f32.mrf.mxu3 }
  0xbc   : > { %v366_v36 = vsel %vm326_vm1, %v1345_v35, -inf }
  0xbd   : > { %367 = vmax.xlane.f32.xlu1 %v366_v36  ;;  %v1349_v37 = vpop.f32.mrf.mxu0 }
  0xbe   : > { %v342_v38 = vsel %vm326_vm1, %v1349_v37, -inf }
  0xbf   : > { %343 = vmax.xlane.f32.xlu2 %v342_v38 }
  0xc3   : > { %v1369_v47 = vpop.f32.mrf.mxu3 }
  0xc4   : > { %v369_v48 = vsel %vm326_vm1, %v1369_v47, -inf }
  0xc5   : > { %v1353_v39 = vpop.f32.mrf.mxu0 }
  0xc6   : > { %v345_v40 = vsel %vm326_vm1, %v1353_v39, -inf }
  0xc7   : > { %346 = vmax.xlane.f32.xlu2 %v345_v40 }
  0xcb   : > { %v1373_v49 = vpop.f32.mrf.mxu3 }
  0xcc   : > { %v372_v50 = vsel %vm326_vm1, %v1373_v49, -inf }
  0xcd   : > { %v1357_v41 = vpop.f32.mrf.mxu0 }
  0xce   : > { %v348_v51 = vsel %vm326_vm1, %v1357_v41, -inf }
  0xd5   : > { %v1359_v42 = vpop.f32.mrf.mxu0 }
  0xd6   : > { %v351_v43 = vsel %vm326_vm1, %v1359_v42, -inf }
  0xd7   : > { %352 = vmax.xlane.f32.xlu0 %v351_v43 }
  0xdf   : > { %328 = vmax.xlane.f32.xlu0 %v327_v44 }
  0xe7   : > { %361 = vmax.xlane.f32.xlu0 %v360_v45 }
  0xef   : > { %340 = vmax.xlane.f32.xlu0 %v339_v46 }
  0xf7   : > { %370 = vmax.xlane.f32.xlu0 %v369_v48 }
  0xff   : > { %373 = vmax.xlane.f32.xlu0 %v372_v50 }
 0x107   : > { %349 = vmax.xlane.f32.xlu0 %v348_v51 }
 0x110   : > { %v356_v52 = vpop.xlane.xlu1 %355 }
 0x111   : > { %v384_v53 = vsub.f32 %v305_v21, %v356_v52 }
 0x113   : > { %v409_v54 = vmul.f32 1.442695, %v384_v53 }
 0x115   : > { %1075 = vpow2.f32 %v409_v54 }
 0x118   : > { %v359_v55 = vpop.xlane.xlu2 %358  ;;  %v1379_v57 = vpop.xlane.xlu1 %331 }
 0x119   : > { %v385_v56 = vsub.f32 %v308_v24, %v359_v55 }
 0x11b   : > { %v1381_v58 = vpop.eup %1075  ;;  %v411_v59 = vmul.f32 1.442695, %v385_v56 }
 0x11c   : > { %v450_v60 = vsel %vm326_vm1, %v1381_v58, 0.0 }
 0x11d   : > { %1077 = vpow2.f32 %v411_v59  ;;  %451 = vadd.xlane.f32.xlu2 %v450_v60 }
 0x120   : > { %v335_v61 = vpop.xlane.xlu2 %334 }
 0x121   : > { %v377_v62 = vsub.f32 %v284_v27, %v335_v61 }
 0x122   : > { %v338_v63 = vpop.xlane.xlu1 %337 }
 0x123   : > { %v1385_v0 = vpop.eup %1077  ;;  %v395_v1 = vmul.f32 1.442695, %v377_v62  ;;  %v378_v2 = vsub.f32 %v287_v30, %v338_v63 }
 0x124   : > { %v453_v3 = vsel %vm326_vm1, %v1385_v0, 0.0 }
 0x125   : > { %1079 = vpow2.f32 %v395_v1  ;;  %v397_v4 = vmul.f32 1.442695, %v378_v2  ;;  %454 = vadd.xlane.f32.xlu2 %v453_v3 }
 0x127   : > { %1081 = vpow2.f32 %v397_v4 }
 0x128   : > { %v365_v5 = vpop.xlane.xlu2 %364 }
 0x129   : > { %v387_v6 = vsub.f32 %v314_v32, %v365_v5 }
 0x12b   : > { %v1389_v7 = vpop.eup %1079  ;;  %v415_v8 = vmul.f32 1.442695, %v387_v6 }
 0x12c   : > { %v429_v9 = vsel %vm326_vm1, %v1389_v7, 0.0 }
 0x12d   : > { %v1393_v10 = vpop.eup %1081  ;;  %1083 = vpow2.f32 %v415_v8  ;;  %430 = vadd.xlane.f32.xlu0 %v429_v9  ;;  %v509_v8 = vld [vmem:[%s1654_s2 + $0x30] sm:$0xff]  ;;  %v508_v9 = vld [vmem:[%s1654_s2 + $0x28] sm:$0xff] }
 0x12e   : > { %v432_v11 = vsel %vm326_vm1, %v1393_v10, 0.0 }
 0x12f   : > { %433 = vadd.xlane.f32.xlu2 %v432_v11  ;;  %v507_v11 = vld [vmem:[%s1654_s2 + $0x20] sm:$0xff] }
 0x130   : > { %v368_v12 = vpop.xlane.xlu1 %367 }
 0x131   : > { %v388_v13 = vsub.f32 %v1345_v35, %v368_v12  ;;  %v506_v12 = vld [vmem:[%s1654_s2 + $0x18] sm:$0xff] }
 0x132   : > { %v344_v14 = vpop.xlane.xlu2 %343 }
 0x133   : > { %v1398_v15 = vpop.eup %1083  ;;  %v417_v16 = vmul.f32 1.442695, %v388_v13  ;;  %v380_v17 = vsub.f32 %v1349_v37, %v344_v14  ;;  %v505_v13 = vld [vmem:[%s1654_s2 + $0x10] sm:$0xff]  ;;  %v504_v14 = vld [vmem:[%s1654_s2 + $0x8] sm:$0xff] }
 0x134   : > { %v459_v18 = vsel %vm326_vm1, %v1398_v15, 0.0 }
 0x135   : > { %1085 = vpow2.f32 %v417_v16  ;;  %v401_v19 = vmul.f32 1.442695, %v380_v17  ;;  %460 = vadd.xlane.f32.xlu0 %v459_v18  ;;  %v503_v16 = vld [vmem:[%s1654_s2] sm:$0xff] }
 0x137   : > { %1087 = vpow2.f32 %v401_v19 }
 0x13a   : > { %v347_v21 = vpop.xlane.xlu2 %346 }
 0x13b   : > { %v1403_v22 = vpop.eup %1085  ;;  %v381_v24 = vsub.f32 %v1353_v39, %v347_v21  ;;  %v376_v39 = vsub.f32 %v1333_v23, %v1379_v57 }
 0x13c   : > { %v462_v25 = vsel %vm326_vm1, %v1403_v22, 0.0 }
 0x13d   : > { %v1408_v26 = vpop.eup %1087  ;;  %v403_v27 = vmul.f32 1.442695, %v381_v24  ;;  %463 = vadd.xlane.f32.xlu2 %v462_v25  ;;  %v393_v44 = vmul.f32 1.442695, %v376_v39 }
 0x13e   : > { %v438_v29 = vsel %vm326_vm1, %v1408_v26, 0.0 }
 0x13f   : > { %1089 = vpow2.f32 %v403_v27  ;;  %439 = vadd.xlane.f32.xlu0 %v438_v29 }
 0x145   : > { %v1412_v30 = vpop.eup %1089 }
 0x146   : > { %v441_v31 = vsel %vm326_vm1, %v1412_v30, 0.0 }
 0x147   : > { %442 = vadd.xlane.f32.xlu2 %v441_v31 }
 0x14a   : > { %v353_v32 = vpop.xlane.xlu0 %352 }
 0x14b   : > { %v383_v33 = vsub.f32 %v1359_v42, %v353_v32 }
 0x14d   : > { %v407_v35 = vmul.f32 1.442695, %v383_v33 }
 0x14f   : > { %1091 = vpow2.f32 %v407_v35 }
 0x152   : > { %v329_v36 = vpop.xlane.xlu0 %328 }
 0x153   : > { %v375_v37 = vsub.f32 %v1330_v20, %v329_v36 }
 0x155   : > { %v1418_v38 = vpop.eup %1091  ;;  %v391_v40 = vmul.f32 1.442695, %v375_v37 }
 0x156   : > { %v447_v43 = vsel %vm326_vm1, %v1418_v38, 0.0 }
 0x157   : > { %1093 = vpow2.f32 %v391_v40  ;;  %448 = vadd.xlane.f32.xlu1 %v447_v43 }
 0x158   : > { %1095 = vpow2.f32 %v393_v44 }
 0x15a   : > { %v362_v45 = vpop.xlane.xlu0 %361 }
 0x15b   : > { %v386_v42 = vsub.f32 %v1338_v28, %v362_v45 }
 0x15d   : > { %v1424_v46 = vpop.eup %1093  ;;  %v413_v48 = vmul.f32 1.442695, %v386_v42 }
 0x15e   : > { %v423_v20 = vsel %vm326_vm1, %v1424_v46, 0.0  ;;  %v1429_v23 = vpop.eup %1095 }
 0x15f   : > { %424 = vadd.xlane.f32.xlu1 %v423_v20  ;;  %1097 = vpow2.f32 %v413_v48  ;;  %v426_v52 = vsel %vm326_vm1, %v1429_v23, 0.0 }
 0x162   : > { %v341_v50 = vpop.xlane.xlu0 %340 }
 0x163   : > { %v379_v51 = vsub.f32 %v1343_v34, %v341_v50 }
 0x165   : > { %v399_v53 = vmul.f32 1.442695, %v379_v51  ;;  %v1434_v55 = vpop.eup %1097 }
 0x166   : > { %v456_v56 = vsel %vm326_vm1, %v1434_v55, 0.0 }
 0x167   : > { %427 = vadd.xlane.f32.xlu1 %v426_v52  ;;  %1099 = vpow2.f32 %v399_v53 }
 0x16a   : > { %v371_v54 = vpop.xlane.xlu0 %370 }
 0x16b   : > { %v389_v28 = vsub.f32 %v1369_v47, %v371_v54 }
 0x16d   : > { %v419_v57 = vmul.f32 1.442695, %v389_v28  ;;  %v1439_v60 = vpop.eup %1099 }
 0x16e   : > { %v435_v62 = vsel %vm326_vm1, %v1439_v60, 0.0 }
 0x16f   : > { %457 = vadd.xlane.f32.xlu1 %v456_v56  ;;  %1101 = vpow2.f32 %v419_v57 }
 0x172   : > { %v374_v59 = vpop.xlane.xlu0 %373 }
 0x173   : > { %v390_v34 = vsub.f32 %v1373_v49, %v374_v59 }
 0x175   : > { %v421_v61 = vmul.f32 1.442695, %v390_v34  ;;  %v1444_v1 = vpop.eup %1101 }
 0x176   : > { %v465_v4 = vsel %vm326_vm1, %v1444_v1, 0.0 }
 0x177   : > { %1103 = vpow2.f32 %v421_v61  ;;  %436 = vadd.xlane.f32.xlu1 %v435_v62 }
 0x17a   : > { %v350_v63 = vpop.xlane.xlu0 %349 }
 0x17b   : > { %v382_v47 = vsub.f32 %v1357_v41, %v350_v63  ;;  %v510_v41 = vld [vmem:[%s1654_s2 + $0x38] sm:$0xff] }
 0x17c   : > { %979 = vmatpush.msra.mxu2 %v510_v41  ;;  %567 = vmatpush.msra.mxu1 %v510_v41 }
 0x17d   : > { %v1447_v2 = vpop.eup %1103  ;;  %v405_v3 = vmul.f32 1.442695, %v382_v47 }
 0x17e   : > { %v468_v49 = vsel %vm326_vm1, %v1447_v2, 0.0  ;;  %980 = vmatpush.msra.mxu2 %v509_v8  ;;  %568 = vmatpush.msra.mxu1 %v509_v8 }
 0x17f   : > { %1105 = vpow2.f32 %v405_v3  ;;  %466 = vadd.xlane.f32.xlu1 %v465_v4  ;;  %469 = vadd.xlane.f32.xlu0 %v468_v49 }
 0x180   : > { %981 = vmatpush.msra.mxu2 %v508_v9  ;;  %569 = vmatpush.msra.mxu1 %v508_v9 }
 0x182   : > { %982 = vmatpush.msra.mxu2 %v507_v11  ;;  %570 = vmatpush.msra.mxu1 %v507_v11 }
 0x184   : > { %983 = vmatpush.msra.mxu2 %v506_v12  ;;  %571 = vmatpush.msra.mxu1 %v506_v12 }
 0x185   : > { %v1453_v5 = vpop.eup %1105 }
 0x186   : > { %v444_v6 = vsel %vm326_vm1, %v1453_v5, 0.0  ;;  %984 = vmatpush.msra.mxu2 %v505_v13  ;;  %572 = vmatpush.msra.mxu1 %v505_v13 }
 0x187   : > { %445 = vadd.xlane.f32.xlu1 %v444_v6 }
 0x188   : > { %985 = vmatpush.msra.mxu2 %v504_v14  ;;  %573 = vmatpush.msra.mxu1 %v504_v14 }
 0x18a   : > { %986 = vmatpush.msra.mxu2 %v503_v16  ;;  %574 = vmatpush.msra.mxu1 %v503_v16 }
 0x190   : > { %v452_v18 = vpop.xlane.xlu2 %451 }
 0x198   : > { %v455_v25 = vpop.xlane.xlu2 %454 }
 0x1a0   : > { %v431_v35 = vpop.xlane.xlu0 %430 }
 0x1a8   : > { %v461_v43 = vpop.xlane.xlu0 %460 }
 0x1ca   : > { %v449_v17 = vpop.xlane.xlu1 %448 }
 0x1cb   : > { %1107 = vrcp.f32 %v449_v17 }
 0x1cc   : > { %1109 = vrcp.f32 %v452_v18 }
 0x1d1   : > { %v1108_v19 = vpop.eup %1107 }
 0x1d2   : > { %v425_v21 = vpop.xlane.xlu1 %424  ;;  %v495_v24 = vmul.f32 %v1108_v19, %v1418_v38  ;;  %v1110_v27 = vpop.eup %1109 }
 0x1d3   : > { %1111 = vrcp.f32 %v425_v21  ;;  %v496_v33 = vmul.f32 %v1110_v27, %v1381_v58  ;;  %v434_v58 = vpop.xlane.xlu2 %433 }
 0x1d4   : > { %947 = vmatmul.msk.f32.vlgmr.msra.gmra.mxu2 %vm326_vm1, %v495_v24  ;;  %1113 = vrcp.f32 %v455_v25 }
 0x1d9   : > { %v1112_v29 = vpop.eup %1111 }
 0x1da   : > { %v428_v31 = vpop.xlane.xlu1 %427  ;;  %v487_v32 = vmul.f32 %v1112_v29, %v1424_v46  ;;  %v1114_v36 = vpop.eup %1113 }
 0x1db   : > { %1115 = vrcp.f32 %v428_v31  ;;  %v497_v40 = vmul.f32 %v1114_v36, %v1385_v0  ;;  %v464_v0 = vpop.xlane.xlu2 %463 }
 0x1dc   : > { %939 = vmatmul.msk.f32.vlgmr.msra.gmra.mxu1 %vm326_vm1, %v487_v32  ;;  %948 = vmatmul.msk.f32.gmra.mxu2 %vm326_vm1, %v496_v33  ;;  %1117 = vrcp.f32 %v431_v35 }
 0x1e1   : > { %v1116_v37 = vpop.eup %1115 }
 0x1e2   : > { %v458_v38 = vpop.xlane.xlu1 %457  ;;  %v488_v39 = vmul.f32 %v1116_v37, %v1429_v23  ;;  %v1118_v44 = vpop.eup %1117 }
 0x1e3   : > { %1119 = vrcp.f32 %v458_v38  ;;  %v489_v46 = vmul.f32 %v1118_v44, %v1389_v7  ;;  %v440_v7 = vpop.xlane.xlu0 %439 }
 0x1e4   : > { %940 = vmatmul.msk.f32.gmra.mxu1 %vm326_vm1, %v488_v39  ;;  %949 = vmatmul.msk.f32.gmra.mxu2 %vm326_vm1, %v497_v40  ;;  %1121 = vrcp.f32 %v434_v58 }
 0x1e5   : > { %1123 = vrcp.f32 %v461_v43 }
 0x1e6   : > { %1125 = vrcp.f32 %v464_v0 }
 0x1e9   : > { %v1120_v45 = vpop.eup %1119 }
 0x1ea   : > { %v498_v42 = vmul.f32 %v1120_v45, %v1434_v55  ;;  %v437_v20 = vpop.xlane.xlu1 %436  ;;  %v1122_v48 = vpop.eup %1121 }
 0x1eb   : > { %v1124_v50 = vpop.eup %1123  ;;  %1127 = vrcp.f32 %v437_v20  ;;  %v490_v23 = vmul.f32 %v1122_v48, %v1393_v10  ;;  %v443_v10 = vpop.xlane.xlu2 %442 }
 0x1ec   : > { %941 = vmatmul.msk.f32.gmra.mxu1 %vm326_vm1, %v489_v46  ;;  %950 = vmatmul.msk.f32.gmra.mxu2 %vm326_vm1, %v498_v42  ;;  %v499_v51 = vmul.f32 %v1124_v50, %v1398_v15  ;;  %v1126_v52 = vpop.eup %1125  ;;  %1129 = vrcp.f32 %v440_v7 }
 0x1ed   : > { %v500_v28 = vmul.f32 %v1126_v52, %v1403_v22 }
 0x1f1   : > { %v1128_v54 = vpop.eup %1127 }
 0x1f2   : > { %v467_v53 = vpop.xlane.xlu1 %466  ;;  %v491_v55 = vmul.f32 %v1128_v54, %v1439_v60  ;;  %v1130_v15 = vpop.eup %1129 }
 0x1f3   : > { %1131 = vrcp.f32 %v467_v53  ;;  %v470_v56 = vpop.xlane.xlu0 %469  ;;  %v492_v59 = vmul.f32 %v1130_v15, %v1408_v26 }
 0x1f4   : > { %942 = vmatmul.msk.f32.gmra.mxu1 %vm326_vm1, %v490_v23  ;;  %951 = vmatmul.msk.f32.gmra.mxu2 %vm326_vm1, %v499_v51  ;;  %1133 = vrcp.f32 %v443_v10 }
 0x1f5   : > { %1135 = vrcp.f32 %v470_v56 }
 0x1f9   : > { %v1132_v57 = vpop.eup %1131 }
 0x1fa   : > { %v501_v34 = vmul.f32 %v1132_v57, %v1444_v1  ;;  %v1134_v22 = vpop.eup %1133  ;;  %v446_v60 = vpop.xlane.xlu1 %445 }
 0x1fb   : > { %v1136_v61 = vpop.eup %1135  ;;  %1137 = vrcp.f32 %v446_v60  ;;  %v493_v62 = vmul.f32 %v1134_v22, %v1412_v30 }
 0x1fc   : > { %943 = vmatmul.msk.f32.gmra.mxu1 %vm326_vm1, %v491_v55  ;;  %952 = vmatmul.msk.f32.gmra.mxu2 %vm326_vm1, %v500_v28  ;;  %v502_v63 = vmul.f32 %v1136_v61, %v1447_v2 }
 0x201   : > { %v1138_v47 = vpop.eup %1137 }
 0x202   : > { %v494_v26 = vmul.f32 %v1138_v47, %v1453_v5 }
 0x204   : > { %944 = vmatmul.msk.f32.gmra.mxu1 %vm326_vm1, %v492_v59  ;;  %953 = vmatmul.msk.f32.gmra.mxu2 %vm326_vm1, %v501_v34 }
 0x20c   : > { %945 = vmatmul.msk.f32.gmra.mxu1 %vm326_vm1, %v493_v62  ;;  %954 = vmatmul.msk.f32.gmra.mxu2 %vm326_vm1, %v502_v63 }
 0x214   : > { %946 = vmatmul.msk.f32.gmra.mxu1 %vm326_vm1, %v494_v26 }
 0x257   : > { %v600_v1 = vpop.f32.mrf.mxu2 }
 0x258   : > { %632 = vst.msk [vmem:[%s1514_s6 + $0x40] sm:$0xff] %vm326_vm1, %v600_v1 }
 0x259   : > { %v576_v30 = vpop.f32.mrf.mxu1 }
 0x25a   : > { %624 = vst.msk [vmem:[%s1514_s6] sm:$0xff] %vm326_vm1, %v576_v30 }
 0x25f   : > { %v603_v2 = vpop.f32.mrf.mxu2 }
 0x260   : > { %633 = vst.msk [vmem:[%s1514_s6 + $0x48] sm:$0xff] %vm326_vm1, %v603_v2 }
 0x261   : > { %v579_v3 = vpop.f32.mrf.mxu1 }
 0x262   : > { %625 = vst.msk [vmem:[%s1514_s6 + $0x8] sm:$0xff] %vm326_vm1, %v579_v3 }
 0x267   : > { %v606_v4 = vpop.f32.mrf.mxu2 }
 0x268   : > { %634 = vst.msk [vmem:[%s1514_s6 + $0x50] sm:$0xff] %vm326_vm1, %v606_v4 }
 0x269   : > { %v582_v49 = vpop.f32.mrf.mxu1 }
 0x26a   : > { %626 = vst.msk [vmem:[%s1514_s6 + $0x10] sm:$0xff] %vm326_vm1, %v582_v49 }
 0x26f   : > { %v609_v5 = vpop.f32.mrf.mxu2 }
 0x270   : > { %635 = vst.msk [vmem:[%s1514_s6 + $0x58] sm:$0xff] %vm326_vm1, %v609_v5 }
 0x271   : > { %v585_v6 = vpop.f32.mrf.mxu1 }
 0x272   : > { %627 = vst.msk [vmem:[%s1514_s6 + $0x18] sm:$0xff] %vm326_vm1, %v585_v6 }
 0x277   : > { %v612_v41 = vpop.f32.mrf.mxu2 }
 0x278   : > { %636 = vst.msk [vmem:[%s1514_s6 + $0x60] sm:$0xff] %vm326_vm1, %v612_v41 }
 0x279   : > { %v588_v8 = vpop.f32.mrf.mxu1 }
 0x27a   : > { %628 = vst.msk [vmem:[%s1514_s6 + $0x20] sm:$0xff] %vm326_vm1, %v588_v8 }
 0x27f   : > { %v615_v9 = vpop.f32.mrf.mxu2 }
 0x280   : > { %637 = vst.msk [vmem:[%s1514_s6 + $0x68] sm:$0xff] %vm326_vm1, %v615_v9 }
 0x281   : > { %v591_v11 = vpop.f32.mrf.mxu1 }
 0x282   : > { %629 = vst.msk [vmem:[%s1514_s6 + $0x28] sm:$0xff] %vm326_vm1, %v591_v11 }
 0x287   : > { %v618_v12 = vpop.f32.mrf.mxu2 }
 0x288   : > { %638 = vst.msk [vmem:[%s1514_s6 + $0x70] sm:$0xff] %vm326_vm1, %v618_v12 }
 0x289   : > { %v594_v13 = vpop.f32.mrf.mxu1 }
 0x28a   : > { %630 = vst.msk [vmem:[%s1514_s6 + $0x30] sm:$0xff] %vm326_vm1, %v594_v13 }
 0x28e   : > { %646 = sbr.rel (!%p1272_p4) target bundleno = 707 (0x2c3), region = 36 }
 0x28f   : > { %v621_v14 = vpop.f32.mrf.mxu2 }
 0x290   : > { %639 = vst.msk [vmem:[%s1514_s6 + $0x78] sm:$0xff] %vm326_vm1, %v621_v14 }
 0x291   : > { %v597_v16 = vpop.f32.mrf.mxu1 }
 0x292   : > { %631 = vst.msk [vmem:[%s1514_s6 + $0x38] sm:$0xff] %vm326_vm1, %v597_v16 }
 0x293   : > { %s1666_s12 = smov (!%p649_p8, %s648_s12), 16 }
 0x294   : > { %s957_s11 = sshll.u32 %s1666_s12, 3 }
 0x295   : > { %p960_p9 = scmp.eq.s32.totalorder %s957_s11, 0 }
 0x296   : > { %s1561_s14 = sshrl.u32 (!%p960_p9), %s1666_s12, 4 }
 0x297   : > { %657 = sbr.rel (%p960_p9) target bundleno = 707 (0x2c3), region = 40  ;;  %p961_p10 = scmp.le.s32.totalorder (!%p960_p9), %s1561_s14, 0 }
 0x29c   : > { %872 = sbr.rel (%p961_p10) target bundleno = 690 (0x2b2), region = 116  ;;  %s1657_s15 = smov (!%p961_p10), %s1555_s10 }
 0x29d   : > { %s1658_s20 = smov (!%p961_p10), %s1514_s6  ;;  %s1570_s25 = smov (!%p961_p10), 0  }
 0x29e   : > { %s1572_s17 = smov (!%p961_p10), 0  }
 0x2a1 LB: >> { %v750_v17 = vld [vmem:[%s1201_s20] sm:$0xff]  ;;  %v752_v18 = vld [vmem:[%s1201_s20 + $0x8] sm:$0xff]  ;;  %v754_v19 = vld [vmem:[%s1201_s20 + $0x10] sm:$0xff]  ;;  %s782_s18 = sadd.s32 1, %s1205_s25  ;;  %s744_s17 = sadd.s32 1, %s1209_s17   ;;  %s1209_s17 = sphi %s1572_s17, %s744_s17   ;;  %s1205_s25 = sphi %s1570_s25, %s1661_s25   ;;  %s1201_s20 = sphi %s1658_s20, %s1660_s20   ;;  %s1197_s15 = sphi %s1657_s15, %s1659_s15  }
 0x2a2   : >> { %751 = vst [vmem:[%s1197_s15] sm:$0xff] %v750_v17  ;;  %v756_v21 = vld [vmem:[%s1201_s20 + $0x18] sm:$0xff]  ;;  %p783_p11 = scmp.ge.s32.totalorder %s782_s18, %s1561_s14  ;;  %v758_v24 = vld [vmem:[%s1201_s20 + $0x20] sm:$0xff]  ;;  %v760_v25 = vld [vmem:[%s1201_s20 + $0x28] sm:$0xff]  ;;  %p743_p12 = scmp.ge.s32.totalorder %s744_s17, %s1561_s14 }
 0x2a3   : >> { %753 = vst [vmem:[%s1197_s15 + $0x8] sm:$0xff] %v752_v18  ;;  %v762_v27 = vld [vmem:[%s1201_s20 + $0x30] sm:$0xff]  ;;  %v764_v29 = vld [vmem:[%s1201_s20 + $0x38] sm:$0xff]  ;;  %v766_v31 = vld [vmem:[%s1201_s20 + $0x40] sm:$0xff] }
 0x2a4   : >> { %755 = vst [vmem:[%s1197_s15 + $0x10] sm:$0xff] %v754_v19  ;;  %s1668_s18 = smov (%p783_p11, %s782_s18), 0  ;;  %v768_v32 = vld [vmem:[%s1201_s20 + $0x48] sm:$0xff]  ;;  %v770_v33 = vld [vmem:[%s1201_s20 + $0x50] sm:$0xff]  ;;  %v772_v35 = vld [vmem:[%s1201_s20 + $0x58] sm:$0xff] }
 0x2a5   : >> { %757 = vst [vmem:[%s1197_s15 + $0x18] sm:$0xff] %v756_v21  ;;  %s962_s21 = sshll.u32 %s1668_s18, 7  ;;  %v774_v36 = vld [vmem:[%s1201_s20 + $0x60] sm:$0xff]  ;;  %v776_v37 = vld [vmem:[%s1201_s20 + $0x68] sm:$0xff]  ;;  %v778_v38 = vld [vmem:[%s1201_s20 + $0x70] sm:$0xff]  ;;  %s1661_s25 = smov %s1668_s18 }
 0x2a6   : >> { %759 = vst [vmem:[%s1197_s15 + $0x20] sm:$0xff] %v758_v24  ;;  %s787_s22 = scalar_lea.vmem %s1514_s6, %s962_s21 [#allocation2]   ;;  %s788_s23 = scalar_lea.vmem %s1555_s10, %s962_s21   ;;  %v780_v39 = vld [vmem:[%s1201_s20 + $0x78] sm:$0xff] }
 0x2a7   : >> { %761 = vst [vmem:[%s1197_s15 + $0x28] sm:$0xff] %v760_v25  ;;  %s1660_s20 = smov %s787_s22 }
 0x2a8   : >> { %763 = vst [vmem:[%s1197_s15 + $0x30] sm:$0xff] %v762_v27 }
 0x2a9   : >> { %765 = vst [vmem:[%s1197_s15 + $0x38] sm:$0xff] %v764_v29 }
 0x2aa   : >> { %767 = vst [vmem:[%s1197_s15 + $0x40] sm:$0xff] %v766_v31 }
 0x2ab   : >> { %769 = vst [vmem:[%s1197_s15 + $0x48] sm:$0xff] %v768_v32 }
 0x2ac   : >> { %771 = vst [vmem:[%s1197_s15 + $0x50] sm:$0xff] %v770_v33 }
 0x2ad   : >> { %773 = vst [vmem:[%s1197_s15 + $0x58] sm:$0xff] %v772_v35  ;;  %746 = sbr.rel (!%p743_p12) target bundleno = 673 (0x2a1), region = 122 }
 0x2ae   : >> { %775 = vst [vmem:[%s1197_s15 + $0x60] sm:$0xff] %v774_v36 }
 0x2af   : >> { %777 = vst [vmem:[%s1197_s15 + $0x68] sm:$0xff] %v776_v37 }
 0x2b0   : >> { %779 = vst [vmem:[%s1197_s15 + $0x70] sm:$0xff] %v778_v38 }
 0x2b1   : >> { %781 = vst [vmem:[%s1197_s15 + $0x78] sm:$0xff] %v780_v39  ;;  %s1659_s15 = smov %s788_s23 }
 0x2b2 PF: > { %s1634_s24 = sand.u32 15, %s1666_s12   ;;  %s973_s26 = sshll.u32 %s1561_s14, 7 }
 0x2b3   : > { %s793_s27 = scalar_lea.vmem %s1514_s6, %s973_s26 [#allocation2]   ;;  %s795_s28 = scalar_lea.vmem %s1555_s10, %s973_s26  }
 0x2b4   : > { %p967_p13 = scmp.le.s32.totalorder %s1634_s24, 0 }
 0x2b5   : > { %s1211_s29 = smov (!%p967_p13), %s795_s28   ;;  %s1215_s30 = smov (!%p967_p13), %s793_s27  }
 0x2b6   : > { %886 = sbr.rel (%p967_p13) target bundleno = 707 (0x2c3), region = 127  ;;  %s1219_s4 = smov (!%p967_p13), 0  }
 0x2b7   : > { %s1223_s5 = smov (!%p967_p13), 0  }
 0x2bb LB: >> { %v805_v40 = vld [vmem:[%s1217_s30] sm:$0xff]  ;;  %s807_s12 = sadd.s32 1, %s1221_s4  ;;  %s799_s5 = sadd.s32 1, %s1225_s5   ;;  %s1225_s5 = sphi %s1223_s5, %s799_s5   ;;  %s1221_s4 = sphi %s1219_s4, %s1220_s4   ;;  %s1217_s30 = sphi %s1215_s30, %s812_s30   ;;  %s1213_s29 = sphi %s1211_s29, %s813_s29  }
 0x2bc   : >> { %806 = vst [vmem:[%s1213_s29] sm:$0xff] %v805_v40  ;;  %p808_p0 = scmp.ge.s32.totalorder %s807_s12, %s1634_s24  ;;  %p798_p1 = scmp.ge.s32.totalorder %s799_s5, %s1634_s24 }
 0x2be   : >> { %s1670_s12 = smov (%p808_p0, %s807_s12), 0  ;;  %801 = sbr.rel (!%p798_p1) target bundleno = 699 (0x2bb), region = 133 }
 0x2bf   : >> { %s968_s6 = sshll.u32 %s1670_s12, 3  ;;  %s1220_s4 = smov %s1670_s12  }
 0x2c0   : >> { %s812_s30 = scalar_lea.vmem %s793_s27, %s968_s6 [#allocation2]   ;;  %s813_s29 = scalar_lea.vmem %s795_s28, %s968_s6  }
 0x2c3 PF: > { %p10_p2 = scmp.ge.s32.totalorder %s1262_s16, 4   ;;  %s1662_s12 = smov %s1189_s13 }
 0x2c4   : > { %s1663_s13 = smov %s1270_s19  ;;  %s1664_s14 = smov %s1262_s16 }
 0x2c5   :  { %12 = sbr.rel (!%p10_p2) target bundleno = 2 (0x2), region = 144 }

// kernel: tpu_custom_call.1
= control target key start
LH: loop header
LB: loop body
LE: loop exit
PB: predicated region body
PF: predicated region fallthrough
CT: control target
= control target key end

     0   :  { %s1247_s12 = smov 0   ;;  %s1249_s13 = smov 0   ;;  %s1652_s0 = inlined_call_operand.vmem [shape: f32[200,32], index: 0, kind: input, shape index: {}]   ;;  %s1653_s1 = inlined_call_operand.vmem [shape: f32[32,64], index: 1, kind: input, shape index: {}]   ;;  %s1654_s2 = inlined_call_operand.vmem [shape: f32[64,64], index: 2, kind: input, shape index: {}]   ;;  %s1655_s3 = inlined_call_operand.vmem [shape: f32[200,64], index: 3, kind: output, shape index: {}]  }
   0x1   :  { %s1251_s14 = smov 0  }
   0x2 LB: > { %s1260_s15 = sadd.s32 4294967295, %s1193_s14   ;;  %s1262_s16 = sadd.s32 1, %s1193_s14   ;;  %s1193_s14 = sphi %s1251_s14, %s1664_s14   ;;  %s1189_s13 = sphi %s1249_s13, %s1663_s13   ;;  %s1185_s12 = sphi %s1247_s12, %s1662_s12  }
   0x3   : > { %s85_s17 = ssub.s32 %s1193_s14, %s1262_s16  ;;  %s88_s18 = sadd.s32 1, %s1189_s13 }
   0x4   : > { %p86_p0 = scmp.eq.s32.totalorder %s85_s17, 0  ;;  %p98_p1 = scmp.ne.s32.totalorder %s1189_s13, %s1185_s12 }
   0x5   : > { %p99_p2 = scmp.eq.s32.totalorder %s1260_s15, 1  ;;  %p919_p3 = scmp.ge.s32.totalorder %s1193_s14, 1 }
   0x6   : > { %s1270_s19 = scalar_select %p86_p0, %s1189_s13, %s88_s18  }
   0x7   : > { %p1272_p4 = por %p99_p2, %p98_p1  ;;  %p146_p5 = scmp.lt.s32.totalorder %s1193_s14, 3 }
   0x9   : > { %p147_p6 = pnand %p919_p3, %p146_p5 }
   0xa   : > { %s1283_s25 = sshll.u32 (!%p147_p6), %s1260_s15, 4 }
   0xb   : > { %150 = sbr.rel (%p147_p6) target bundleno = 707 (0x2c3), region = 32  ;;  %p178_p7 = scmp.lt.s32.totalorder (!%p147_p6), %s1283_s25, 24 }
  0x10   : > { %v211_v0 = vld [vmem:[%s1653_s1 + $0x18] sm:$0xff]  ;;  %v210_v1 = vld [vmem:[%s1653_s1 + $0x10] sm:$0xff]  ;;  %v209_v2 = vld [vmem:[%s1653_s1 + $0x8] sm:$0xff]  ;;  %s179_s28 = scalar_select %p178_p7, %s1283_s25, 24  ;;  %vm212_vm0 = vcmask 261120   ;;  %vm326_vm1 = vcmask 523264  }
  0x11   : > { %273 = vmatpush.msra.mxu0 %v211_v0  ;;  %975 = vmatpush.msra.mxu3 %v211_v0  ;;  %v208_v3 = vld [vmem:[%s1653_s1] sm:$0xff] }
  0x12   : > { %s922_s4 = sshll.u32 %s179_s28, 3 }
  0x13   : > { %274 = vmatpush.msra.mxu0 %v210_v1  ;;  %976 = vmatpush.msra.mxu3 %v210_v1  ;;  %s1296_s7 = scalar_lea.vmem %s1652_s0, %s922_s4  ;;  %s170_s4 = sand.u32 1, %s1185_s12  }
  0x14   : > { %v192_v4 = vld [vmem:[%s1296_s7] sm:$0xff]  ;;  %v201_v5 = vld [vmem:[%s1296_s7 + $0x48] sm:$0xff]  ;;  %v202_v7 = vld [vmem:[%s1296_s7 + $0x50] sm:$0xff]  ;;  %s920_s5 = sshll.u32 %s170_s4, 7  ;;  %s648_s12 = ssub.s32 (%p1272_p4), 25, %s1283_s25 }
  0x15   : > { %275 = vmatpush.msra.mxu0 %v209_v2  ;;  %977 = vmatpush.msra.mxu3 %v209_v2  ;;  %v193_v6 = vld [vmem:[%s1296_s7 + $0x8] sm:$0xff]  ;;  %v194_v8 = vld [vmem:[%s1296_s7 + $0x10] sm:$0xff]  ;;  %v203_v9 = vld [vmem:[%s1296_s7 + $0x58] sm:$0xff]  ;;  %s1514_s6 = scalar_lea.vmem [#allocation2], %s920_s5   ;;  %p649_p8 = scmp.lt.s32.totalorder (%p1272_p4), %s648_s12, 16 }
  0x16   : > { %v195_v10 = vld [vmem:[%s1296_s7 + $0x18] sm:$0xff]  ;;  %v204_v11 = vld [vmem:[%s1296_s7 + $0x60] sm:$0xff]  ;;  %v205_v13 = vld [vmem:[%s1296_s7 + $0x68] sm:$0xff] }
  0x17   : > { %276 = vmatpush.msra.mxu0 %v208_v3  ;;  %978 = vmatpush.msra.mxu3 %v208_v3  ;;  %v196_v12 = vld [vmem:[%s1296_s7 + $0x20] sm:$0xff]  ;;  %v197_v14 = vld [vmem:[%s1296_s7 + $0x28] sm:$0xff]  ;;  %v206_v15 = vld [vmem:[%s1296_s7 + $0x70] sm:$0xff] }
  0x18   : > { %923 = vmatmul.msk.f32.vlgmr.msra.gmra.mxu0 %vm212_vm0, %v192_v4  ;;  %932 = vmatmul.msk.f32.vlgmr.msra.gmra.mxu3 %vm212_vm0, %v201_v5  ;;  %v198_v16 = vld [vmem:[%s1296_s7 + $0x30] sm:$0xff]  ;;  %v207_v17 = vld [vmem:[%s1296_s7 + $0x78] sm:$0xff]  ;;  %v200_v19 = vld [vmem:[%s1296_s7 + $0x40] sm:$0xff] }
  0x19   : > { %v199_v18 = vld [vmem:[%s1296_s7 + $0x38] sm:$0xff]  ;;  %s972_s7 = sshll.u32 (%p1272_p4), %s1260_s15, 7 }
  0x1a   : > { %s1555_s10 = scalar_lea.vmem (%p1272_p4), %s1655_s3, %s972_s7  }
  0x20   : > { %924 = vmatmul.msk.f32.gmra.mxu0 %vm212_vm0, %v193_v6  ;;  %933 = vmatmul.msk.f32.gmra.mxu3 %vm212_vm0, %v202_v7 }
  0x28   : > { %925 = vmatmul.msk.f32.gmra.mxu0 %vm212_vm0, %v194_v8  ;;  %934 = vmatmul.msk.f32.gmra.mxu3 %vm212_vm0, %v203_v9 }
  0x30   : > { %926 = vmatmul.msk.f32.gmra.mxu0 %vm212_vm0, %v195_v10  ;;  %935 = vmatmul.msk.f32.gmra.mxu3 %vm212_vm0, %v204_v11 }
  0x38   : > { %927 = vmatmul.msk.f32.gmra.mxu0 %vm212_vm0, %v196_v12  ;;  %936 = vmatmul.msk.f32.gmra.mxu3 %vm212_vm0, %v205_v13 }
  0x40   : > { %928 = vmatmul.msk.f32.gmra.mxu0 %vm212_vm0, %v197_v14  ;;  %937 = vmatmul.msk.f32.gmra.mxu3 %vm212_vm0, %v206_v15 }
  0x48   : > { %929 = vmatmul.msk.f32.gmra.mxu0 %vm212_vm0, %v198_v16  ;;  %938 = vmatmul.msk.f32.gmra.mxu3 %vm212_vm0, %v207_v17 }
  0x50   : > { %930 = vmatmul.msk.f32.gmra.mxu0 %vm212_vm0, %v199_v18 }
  0x58   : > { %931 = vmatmul.msk.f32.gmra.mxu0 %vm212_vm0, %v200_v19 }
  0x95   : > { %v1330_v20 = vpop.f32.mrf.mxu0 }
  0x96   : > { %v327_v44 = vsel %vm326_vm1, %v1330_v20, -inf }
  0x9b   : > { %v305_v21 = vpop.f32.mrf.mxu3 }
  0x9c   : > { %v354_v22 = vsel %vm326_vm1, %v305_v21, -inf }
  0x9d   : > { %355 = vmax.xlane.f32.xlu1 %v354_v22  ;;  %v1333_v23 = vpop.f32.mrf.mxu0 }
  0x9e   : > { %v330_v26 = vsel %vm326_vm1, %v1333_v23, -inf }
  0xa3   : > { %v308_v24 = vpop.f32.mrf.mxu3 }
  0xa4   : > { %v357_v25 = vsel %vm326_vm1, %v308_v24, -inf }
  0xa5   : > { %358 = vmax.xlane.f32.xlu2 %v357_v25  ;;  %331 = vmax.xlane.f32.xlu1 %v330_v26  ;;  %v284_v27 = vpop.f32.mrf.mxu0 }
  0xa6   : > { %v333_v29 = vsel %vm326_vm1, %v284_v27, -inf }
  0xab   : > { %v1338_v28 = vpop.f32.mrf.mxu3 }
  0xac   : > { %v360_v45 = vsel %vm326_vm1, %v1338_v28, -inf }
  0xad   : > { %334 = vmax.xlane.f32.xlu2 %v333_v29  ;;  %v287_v30 = vpop.f32.mrf.mxu0 }
  0xae   : > { %v336_v31 = vsel %vm326_vm1, %v287_v30, -inf }
  0xaf   : > { %337 = vmax.xlane.f32.xlu1 %v336_v31 }
  0xb3   : > { %v314_v32 = vpop.f32.mrf.mxu3 }
  0xb4   : > { %v363_v33 = vsel %vm326_vm1, %v314_v32, -inf }
  0xb5   : > { %364 = vmax.xlane.f32.xlu2 %v363_v33  ;;  %v1343_v34 = vpop.f32.mrf.mxu0 }
  0xb6   : > { %v339_v46 = vsel %vm326_vm1, %v1343_v34, -inf }
  0xbb   : > { %v1345_v35 = vpop.f32.mrf.mxu3 }
  0xbc   : > { %v366_v36 = vsel %vm326_vm1, %v1345_v35, -inf }
  0xbd   : > { %367 = vmax.xlane.f32.xlu1 %v366_v36  ;;  %v1349_v37 = vpop.f32.mrf.mxu0 }
  0xbe   : > { %v342_v38 = vsel %vm326_vm1, %v1349_v37, -inf }
  0xbf   : > { %343 = vmax.xlane.f32.xlu2 %v342_v38 }
  0xc3   : > { %v1369_v47 = vpop.f32.mrf.mxu3 }
  0xc4   : > { %v369_v48 = vsel %vm326_vm1, %v1369_v47, -inf }
  0xc5   : > { %v1353_v39 = vpop.f32.mrf.mxu0 }
  0xc6   : > { %v345_v40 = vsel %vm326_vm1, %v1353_v39, -inf }
  0xc7   : > { %346 = vmax.xlane.f32.xlu2 %v345_v40 }
  0xcb   : > { %v1373_v49 = vpop.f32.mrf.mxu3 }
  0xcc   : > { %v372_v50 = vsel %vm326_vm1, %v1373_v49, -inf }
  0xcd   : > { %v1357_v41 = vpop.f32.mrf.mxu0 }
  0xce   : > { %v348_v51 = vsel %vm326_vm1, %v1357_v41, -inf }
  0xd5   : > { %v1359_v42 = vpop.f32.mrf.mxu0 }
  0xd6   : > { %v351_v43 = vsel %vm326_vm1, %v1359_v42, -inf }
  0xd7   : > { %352 = vmax.xlane.f32.xlu0 %v351_v43 }
  0xdf   : > { %328 = vmax.xlane.f32.xlu0 %v327_v44 }
  0xe7   : > { %361 = vmax.xlane.f32.xlu0 %v360_v45 }
  0xef   : > { %340 = vmax.xlane.f32.xlu0 %v339_v46 }
  0xf7   : > { %370 = vmax.xlane.f32.xlu0 %v369_v48 }
  0xff   : > { %373 = vmax.xlane.f32.xlu0 %v372_v50 }
 0x107   : > { %349 = vmax.xlane.f32.xlu0 %v348_v51 }
 0x110   : > { %v356_v52 = vpop.xlane.xlu1 %355 }
 0x111   : > { %v384_v53 = vsub.f32 %v305_v21, %v356_v52 }
 0x113   : > { %v409_v54 = vmul.f32 1.442695, %v384_v53 }
 0x115   : > { %1075 = vpow2.f32 %v409_v54 }
 0x118   : > { %v359_v55 = vpop.xlane.xlu2 %358  ;;  %v1379_v57 = vpop.xlane.xlu1 %331 }
 0x119   : > { %v385_v56 = vsub.f32 %v308_v24, %v359_v55 }
 0x11b   : > { %v1381_v58 = vpop.eup %1075  ;;  %v411_v59 = vmul.f32 1.442695, %v385_v56 }
 0x11c   : > { %v450_v60 = vsel %vm326_vm1, %v1381_v58, 0.0 }
 0x11d   : > { %1077 = vpow2.f32 %v411_v59  ;;  %451 = vadd.xlane.f32.xlu2 %v450_v60 }
 0x120   : > { %v335_v61 = vpop.xlane.xlu2 %334 }
 0x121   : > { %v377_v62 = vsub.f32 %v284_v27, %v335_v61 }
 0x122   : > { %v338_v63 = vpop.xlane.xlu1 %337 }
 0x123   : > { %v1385_v0 = vpop.eup %1077  ;;  %v395_v1 = vmul.f32 1.442695, %v377_v62  ;;  %v378_v2 = vsub.f32 %v287_v30, %v338_v63 }
 0x124   : > { %v453_v3 = vsel %vm326_vm1, %v1385_v0, 0.0 }
 0x125   : > { %1079 = vpow2.f32 %v395_v1  ;;  %v397_v4 = vmul.f32 1.442695, %v378_v2  ;;  %454 = vadd.xlane.f32.xlu2 %v453_v3 }
 0x127   : > { %1081 = vpow2.f32 %v397_v4 }
 0x128   : > { %v365_v5 = vpop.xlane.xlu2 %364 }
 0x129   : > { %v387_v6 = vsub.f32 %v314_v32, %v365_v5 }
 0x12b   : > { %v1389_v7 = vpop.eup %1079  ;;  %v415_v8 = vmul.f32 1.442695, %v387_v6 }
 0x12c   : > { %v429_v9 = vsel %vm326_vm1, %v1389_v7, 0.0 }
 0x12d   : > { %v1393_v10 = vpop.eup %1081  ;;  %1083 = vpow2.f32 %v415_v8  ;;  %430 = vadd.xlane.f32.xlu0 %v429_v9  ;;  %v509_v8 = vld [vmem:[%s1654_s2 + $0x30] sm:$0xff]  ;;  %v508_v9 = vld [vmem:[%s1654_s2 + $0x28] sm:$0xff] }
 0x12e   : > { %v432_v11 = vsel %vm326_vm1, %v1393_v10, 0.0 }
 0x12f   : > { %433 = vadd.xlane.f32.xlu2 %v432_v11  ;;  %v507_v11 = vld [vmem:[%s1654_s2 + $0x20] sm:$0xff] }
 0x130   : > { %v368_v12 = vpop.xlane.xlu1 %367 }
 0x131   : > { %v388_v13 = vsub.f32 %v1345_v35, %v368_v12  ;;  %v506_v12 = vld [vmem:[%s1654_s2 + $0x18] sm:$0xff] }
 0x132   : > { %v344_v14 = vpop.xlane.xlu2 %343 }
 0x133   : > { %v1398_v15 = vpop.eup %1083  ;;  %v417_v16 = vmul.f32 1.442695, %v388_v13  ;;  %v380_v17 = vsub.f32 %v1349_v37, %v344_v14  ;;  %v505_v13 = vld [vmem:[%s1654_s2 + $0x10] sm:$0xff]  ;;  %v504_v14 = vld [vmem:[%s1654_s2 + $0x8] sm:$0xff] }
 0x134   : > { %v459_v18 = vsel %vm326_vm1, %v1398_v15, 0.0 }
 0x135   : > { %1085 = vpow2.f32 %v417_v16  ;;  %v401_v19 = vmul.f32 1.442695, %v380_v17  ;;  %460 = vadd.xlane.f32.xlu0 %v459_v18  ;;  %v503_v16 = vld [vmem:[%s1654_s2] sm:$0xff] }
 0x137   : > { %1087 = vpow2.f32 %v401_v19 }
 0x13a   : > { %v347_v21 = vpop.xlane.xlu2 %346 }
 0x13b   : > { %v1403_v22 = vpop.eup %1085  ;;  %v381_v24 = vsub.f32 %v1353_v39, %v347_v21  ;;  %v376_v39 = vsub.f32 %v1333_v23, %v1379_v57 }
 0x13c   : > { %v462_v25 = vsel %vm326_vm1, %v1403_v22, 0.0 }
 0x13d   : > { %v1408_v26 = vpop.eup %1087  ;;  %v403_v27 = vmul.f32 1.442695, %v381_v24  ;;  %463 = vadd.xlane.f32.xlu2 %v462_v25  ;;  %v393_v44 = vmul.f32 1.442695, %v376_v39 }
 0x13e   : > { %v438_v29 = vsel %vm326_vm1, %v1408_v26, 0.0 }
 0x13f   : > { %1089 = vpow2.f32 %v403_v27  ;;  %439 = vadd.xlane.f32.xlu0 %v438_v29 }
 0x145   : > { %v1412_v30 = vpop.eup %1089 }
 0x146   : > { %v441_v31 = vsel %vm326_vm1, %v1412_v30, 0.0 }
 0x147   : > { %442 = vadd.xlane.f32.xlu2 %v441_v31 }
 0x14a   : > { %v353_v32 = vpop.xlane.xlu0 %352 }
 0x14b   : > { %v383_v33 = vsub.f32 %v1359_v42, %v353_v32 }
 0x14d   : > { %v407_v35 = vmul.f32 1.442695, %v383_v33 }
 0x14f   : > { %1091 = vpow2.f32 %v407_v35 }
 0x152   : > { %v329_v36 = vpop.xlane.xlu0 %328 }
 0x153   : > { %v375_v37 = vsub.f32 %v1330_v20, %v329_v36 }
 0x155   : > { %v1418_v38 = vpop.eup %1091  ;;  %v391_v40 = vmul.f32 1.442695, %v375_v37 }
 0x156   : > { %v447_v43 = vsel %vm326_vm1, %v1418_v38, 0.0 }
 0x157   : > { %1093 = vpow2.f32 %v391_v40  ;;  %448 = vadd.xlane.f32.xlu1 %v447_v43 }
 0x158   : > { %1095 = vpow2.f32 %v393_v44 }
 0x15a   : > { %v362_v45 = vpop.xlane.xlu0 %361 }
 0x15b   : > { %v386_v42 = vsub.f32 %v1338_v28, %v362_v45 }
 0x15d   : > { %v1424_v46 = vpop.eup %1093  ;;  %v413_v48 = vmul.f32 1.442695, %v386_v42 }
 0x15e   : > { %v423_v20 = vsel %vm326_vm1, %v1424_v46, 0.0  ;;  %v1429_v23 = vpop.eup %1095 }
 0x15f   : > { %424 = vadd.xlane.f32.xlu1 %v423_v20  ;;  %1097 = vpow2.f32 %v413_v48  ;;  %v426_v52 = vsel %vm326_vm1, %v1429_v23, 0.0 }
 0x162   : > { %v341_v50 = vpop.xlane.xlu0 %340 }
 0x163   : > { %v379_v51 = vsub.f32 %v1343_v34, %v341_v50 }
 0x165   : > { %v399_v53 = vmul.f32 1.442695, %v379_v51  ;;  %v1434_v55 = vpop.eup %1097 }
 0x166   : > { %v456_v56 = vsel %vm326_vm1, %v1434_v55, 0.0 }
 0x167   : > { %427 = vadd.xlane.f32.xlu1 %v426_v52  ;;  %1099 = vpow2.f32 %v399_v53 }
 0x16a   : > { %v371_v54 = vpop.xlane.xlu0 %370 }
 0x16b   : > { %v389_v28 = vsub.f32 %v1369_v47, %v371_v54 }
 0x16d   : > { %v419_v57 = vmul.f32 1.442695, %v389_v28  ;;  %v1439_v60 = vpop.eup %1099 }
 0x16e   : > { %v435_v62 = vsel %vm326_vm1, %v1439_v60, 0.0 }
 0x16f   : > { %457 = vadd.xlane.f32.xlu1 %v456_v56  ;;  %1101 = vpow2.f32 %v419_v57 }
 0x172   : > { %v374_v59 = vpop.xlane.xlu0 %373 }
 0x173   : > { %v390_v34 = vsub.f32 %v1373_v49, %v374_v59 }
 0x175   : > { %v421_v61 = vmul.f32 1.442695, %v390_v34  ;;  %v1444_v1 = vpop.eup %1101 }
 0x176   : > { %v465_v4 = vsel %vm326_vm1, %v1444_v1, 0.0 }
 0x177   : > { %1103 = vpow2.f32 %v421_v61  ;;  %436 = vadd.xlane.f32.xlu1 %v435_v62 }
 0x17a   : > { %v350_v63 = vpop.xlane.xlu0 %349 }
 0x17b   : > { %v382_v47 = vsub.f32 %v1357_v41, %v350_v63  ;;  %v510_v41 = vld [vmem:[%s1654_s2 + $0x38] sm:$0xff] }
 0x17c   : > { %979 = vmatpush.msra.mxu2 %v510_v41  ;;  %567 = vmatpush.msra.mxu1 %v510_v41 }
 0x17d   : > { %v1447_v2 = vpop.eup %1103  ;;  %v405_v3 = vmul.f32 1.442695, %v382_v47 }
 0x17e   : > { %v468_v49 = vsel %vm326_vm1, %v1447_v2, 0.0  ;;  %980 = vmatpush.msra.mxu2 %v509_v8  ;;  %568 = vmatpush.msra.mxu1 %v509_v8 }
 0x17f   : > { %1105 = vpow2.f32 %v405_v3  ;;  %466 = vadd.xlane.f32.xlu1 %v465_v4  ;;  %469 = vadd.xlane.f32.xlu0 %v468_v49 }
 0x180   : > { %981 = vmatpush.msra.mxu2 %v508_v9  ;;  %569 = vmatpush.msra.mxu1 %v508_v9 }
 0x182   : > { %982 = vmatpush.msra.mxu2 %v507_v11  ;;  %570 = vmatpush.msra.mxu1 %v507_v11 }
 0x184   : > { %983 = vmatpush.msra.mxu2 %v506_v12  ;;  %571 = vmatpush.msra.mxu1 %v506_v12 }
 0x185   : > { %v1453_v5 = vpop.eup %1105 }
 0x186   : > { %v444_v6 = vsel %vm326_vm1, %v1453_v5, 0.0  ;;  %984 = vmatpush.msra.mxu2 %v505_v13  ;;  %572 = vmatpush.msra.mxu1 %v505_v13 }
 0x187   : > { %445 = vadd.xlane.f32.xlu1 %v444_v6 }
 0x188   : > { %985 = vmatpush.msra.mxu2 %v504_v14  ;;  %573 = vmatpush.msra.mxu1 %v504_v14 }
 0x18a   : > { %986 = vmatpush.msra.mxu2 %v503_v16  ;;  %574 = vmatpush.msra.mxu1 %v503_v16 }
 0x190   : > { %v452_v18 = vpop.xlane.xlu2 %451 }
 0x198   : > { %v455_v25 = vpop.xlane.xlu2 %454 }
 0x1a0   : > { %v431_v35 = vpop.xlane.xlu0 %430 }
 0x1a8   : > { %v461_v43 = vpop.xlane.xlu0 %460 }
 0x1ca   : > { %v449_v17 = vpop.xlane.xlu1 %448 }
 0x1cb   : > { %1107 = vrcp.f32 %v449_v17 }
 0x1cc   : > { %1109 = vrcp.f32 %v452_v18 }
 0x1d1   : > { %v1108_v19 = vpop.eup %1107 }
 0x1d2   : > { %v425_v21 = vpop.xlane.xlu1 %424  ;;  %v495_v24 = vmul.f32 %v1108_v19, %v1418_v38  ;;  %v1110_v27 = vpop.eup %1109 }
 0x1d3   : > { %1111 = vrcp.f32 %v425_v21  ;;  %v496_v33 = vmul.f32 %v1110_v27, %v1381_v58  ;;  %v434_v58 = vpop.xlane.xlu2 %433 }
 0x1d4   : > { %947 = vmatmul.msk.f32.vlgmr.msra.gmra.mxu2 %vm326_vm1, %v495_v24  ;;  %1113 = vrcp.f32 %v455_v25 }
 0x1d9   : > { %v1112_v29 = vpop.eup %1111 }
 0x1da   : > { %v428_v31 = vpop.xlane.xlu1 %427  ;;  %v487_v32 = vmul.f32 %v1112_v29, %v1424_v46  ;;  %v1114_v36 = vpop.eup %1113 }
 0x1db   : > { %1115 = vrcp.f32 %v428_v31  ;;  %v497_v40 = vmul.f32 %v1114_v36, %v1385_v0  ;;  %v464_v0 = vpop.xlane.xlu2 %463 }
 0x1dc   : > { %939 = vmatmul.msk.f32.vlgmr.msra.gmra.mxu1 %vm326_vm1, %v487_v32  ;;  %948 = vmatmul.msk.f32.gmra.mxu2 %vm326_vm1, %v496_v33  ;;  %1117 = vrcp.f32 %v431_v35 }
 0x1e1   : > { %v1116_v37 = vpop.eup %1115 }
 0x1e2   : > { %v458_v38 = vpop.xlane.xlu1 %457  ;;  %v488_v39 = vmul.f32 %v1116_v37, %v1429_v23  ;;  %v1118_v44 = vpop.eup %1117 }
 0x1e3   : > { %1119 = vrcp.f32 %v458_v38  ;;  %v489_v46 = vmul.f32 %v1118_v44, %v1389_v7  ;;  %v440_v7 = vpop.xlane.xlu0 %439 }
 0x1e4   : > { %940 = vmatmul.msk.f32.gmra.mxu1 %vm326_vm1, %v488_v39  ;;  %949 = vmatmul.msk.f32.gmra.mxu2 %vm326_vm1, %v497_v40  ;;  %1121 = vrcp.f32 %v434_v58 }
 0x1e5   : > { %1123 = vrcp.f32 %v461_v43 }
 0x1e6   : > { %1125 = vrcp.f32 %v464_v0 }
 0x1e9   : > { %v1120_v45 = vpop.eup %1119 }
 0x1ea   : > { %v498_v42 = vmul.f32 %v1120_v45, %v1434_v55  ;;  %v437_v20 = vpop.xlane.xlu1 %436  ;;  %v1122_v48 = vpop.eup %1121 }
 0x1eb   : > { %v1124_v50 = vpop.eup %1123  ;;  %1127 = vrcp.f32 %v437_v20  ;;  %v490_v23 = vmul.f32 %v1122_v48, %v1393_v10  ;;  %v443_v10 = vpop.xlane.xlu2 %442 }
 0x1ec   : > { %941 = vmatmul.msk.f32.gmra.mxu1 %vm326_vm1, %v489_v46  ;;  %950 = vmatmul.msk.f32.gmra.mxu2 %vm326_vm1, %v498_v42  ;;  %v499_v51 = vmul.f32 %v1124_v50, %v1398_v15  ;;  %v1126_v52 = vpop.eup %1125  ;;  %1129 = vrcp.f32 %v440_v7 }
 0x1ed   : > { %v500_v28 = vmul.f32 %v1126_v52, %v1403_v22 }
 0x1f1   : > { %v1128_v54 = vpop.eup %1127 }
 0x1f2   : > { %v467_v53 = vpop.xlane.xlu1 %466  ;;  %v491_v55 = vmul.f32 %v1128_v54, %v1439_v60  ;;  %v1130_v15 = vpop.eup %1129 }
 0x1f3   : > { %1131 = vrcp.f32 %v467_v53  ;;  %v470_v56 = vpop.xlane.xlu0 %469  ;;  %v492_v59 = vmul.f32 %v1130_v15, %v1408_v26 }
 0x1f4   : > { %942 = vmatmul.msk.f32.gmra.mxu1 %vm326_vm1, %v490_v23  ;;  %951 = vmatmul.msk.f32.gmra.mxu2 %vm326_vm1, %v499_v51  ;;  %1133 = vrcp.f32 %v443_v10 }
 0x1f5   : > { %1135 = vrcp.f32 %v470_v56 }
 0x1f9   : > { %v1132_v57 = vpop.eup %1131 }
 0x1fa   : > { %v501_v34 = vmul.f32 %v1132_v57, %v1444_v1  ;;  %v1134_v22 = vpop.eup %1133  ;;  %v446_v60 = vpop.xlane.xlu1 %445 }
 0x1fb   : > { %v1136_v61 = vpop.eup %1135  ;;  %1137 = vrcp.f32 %v446_v60  ;;  %v493_v62 = vmul.f32 %v1134_v22, %v1412_v30 }
 0x1fc   : > { %943 = vmatmul.msk.f32.gmra.mxu1 %vm326_vm1, %v491_v55  ;;  %952 = vmatmul.msk.f32.gmra.mxu2 %vm326_vm1, %v500_v28  ;;  %v502_v63 = vmul.f32 %v1136_v61, %v1447_v2 }
 0x201   : > { %v1138_v47 = vpop.eup %1137 }
 0x202   : > { %v494_v26 = vmul.f32 %v1138_v47, %v1453_v5 }
 0x204   : > { %944 = vmatmul.msk.f32.gmra.mxu1 %vm326_vm1, %v492_v59  ;;  %953 = vmatmul.msk.f32.gmra.mxu2 %vm326_vm1, %v501_v34 }
 0x20c   : > { %945 = vmatmul.msk.f32.gmra.mxu1 %vm326_vm1, %v493_v62  ;;  %954 = vmatmul.msk.f32.gmra.mxu2 %vm326_vm1, %v502_v63 }
 0x214   : > { %946 = vmatmul.msk.f32.gmra.mxu1 %vm326_vm1, %v494_v26 }
 0x257   : > { %v600_v1 = vpop.f32.mrf.mxu2 }
 0x258   : > { %632 = vst.msk [vmem:[%s1514_s6 + $0x40] sm:$0xff] %vm326_vm1, %v600_v1 }
 0x259   : > { %v576_v30 = vpop.f32.mrf.mxu1 }
 0x25a   : > { %624 = vst.msk [vmem:[%s1514_s6] sm:$0xff] %vm326_vm1, %v576_v30 }
 0x25f   : > { %v603_v2 = vpop.f32.mrf.mxu2 }
 0x260   : > { %633 = vst.msk [vmem:[%s1514_s6 + $0x48] sm:$0xff] %vm326_vm1, %v603_v2 }
 0x261   : > { %v579_v3 = vpop.f32.mrf.mxu1 }
 0x262   : > { %625 = vst.msk [vmem:[%s1514_s6 + $0x8] sm:$0xff] %vm326_vm1, %v579_v3 }
 0x267   : > { %v606_v4 = vpop.f32.mrf.mxu2 }
 0x268   : > { %634 = vst.msk [vmem:[%s1514_s6 + $0x50] sm:$0xff] %vm326_vm1, %v606_v4 }
 0x269   : > { %v582_v49 = vpop.f32.mrf.mxu1 }
 0x26a   : > { %626 = vst.msk [vmem:[%s1514_s6 + $0x10] sm:$0xff] %vm326_vm1, %v582_v49 }
 0x26f   : > { %v609_v5 = vpop.f32.mrf.mxu2 }
 0x270   : > { %635 = vst.msk [vmem:[%s1514_s6 + $0x58] sm:$0xff] %vm326_vm1, %v609_v5 }
 0x271   : > { %v585_v6 = vpop.f32.mrf.mxu1 }
 0x272   : > { %627 = vst.msk [vmem:[%s1514_s6 + $0x18] sm:$0xff] %vm326_vm1, %v585_v6 }
 0x277   : > { %v612_v41 = vpop.f32.mrf.mxu2 }
 0x278   : > { %636 = vst.msk [vmem:[%s1514_s6 + $0x60] sm:$0xff] %vm326_vm1, %v612_v41 }
 0x279   : > { %v588_v8 = vpop.f32.mrf.mxu1 }
 0x27a   : > { %628 = vst.msk [vmem:[%s1514_s6 + $0x20] sm:$0xff] %vm326_vm1, %v588_v8 }
 0x27f   : > { %v615_v9 = vpop.f32.mrf.mxu2 }
 0x280   : > { %637 = vst.msk [vmem:[%s1514_s6 + $0x68] sm:$0xff] %vm326_vm1, %v615_v9 }
 0x281   : > { %v591_v11 = vpop.f32.mrf.mxu1 }
 0x282   : > { %629 = vst.msk [vmem:[%s1514_s6 + $0x28] sm:$0xff] %vm326_vm1, %v591_v11 }
 0x287   : > { %v618_v12 = vpop.f32.mrf.mxu2 }
 0x288   : > { %638 = vst.msk [vmem:[%s1514_s6 + $0x70] sm:$0xff] %vm326_vm1, %v618_v12 }
 0x289   : > { %v594_v13 = vpop.f32.mrf.mxu1 }
 0x28a   : > { %630 = vst.msk [vmem:[%s1514_s6 + $0x30] sm:$0xff] %vm326_vm1, %v594_v13 }
 0x28e   : > { %646 = sbr.rel (!%p1272_p4) target bundleno = 707 (0x2c3), region = 36 }
 0x28f   : > { %v621_v14 = vpop.f32.mrf.mxu2 }
 0x290   : > { %639 = vst.msk [vmem:[%s1514_s6 + $0x78] sm:$0xff] %vm326_vm1, %v621_v14 }
 0x291   : > { %v597_v16 = vpop.f32.mrf.mxu1 }
 0x292   : > { %631 = vst.msk [vmem:[%s1514_s6 + $0x38] sm:$0xff] %vm326_vm1, %v597_v16 }
 0x293   : > { %s1666_s12 = smov (!%p649_p8, %s648_s12), 16 }
 0x294   : > { %s957_s11 = sshll.u32 %s1666_s12, 3 }
 0x295   : > { %p960_p9 = scmp.eq.s32.totalorder %s957_s11, 0 }
 0x296   : > { %s1561_s14 = sshrl.u32 (!%p960_p9), %s1666_s12, 4 }
 0x297   : > { %657 = sbr.rel (%p960_p9) target bundleno = 707 (0x2c3), region = 40  ;;  %p961_p10 = scmp.le.s32.totalorder (!%p960_p9), %s1561_s14, 0 }
 0x29c   : > { %872 = sbr.rel (%p961_p10) target bundleno = 690 (0x2b2), region = 116  ;;  %s1657_s15 = smov (!%p961_p10), %s1555_s10 }
 0x29d   : > { %s1658_s20 = smov (!%p961_p10), %s1514_s6  ;;  %s1570_s25 = smov (!%p961_p10), 0  }
 0x29e   : > { %s1572_s17 = smov (!%p961_p10), 0  }
 0x2a1 LB: >> { %v750_v17 = vld [vmem:[%s1201_s20] sm:$0xff]  ;;  %v752_v18 = vld [vmem:[%s1201_s20 + $0x8] sm:$0xff]  ;;  %v754_v19 = vld [vmem:[%s1201_s20 + $0x10] sm:$0xff]  ;;  %s782_s18 = sadd.s32 1, %s1205_s25  ;;  %s744_s17 = sadd.s32 1, %s1209_s17   ;;  %s1209_s17 = sphi %s1572_s17, %s744_s17   ;;  %s1205_s25 = sphi %s1570_s25, %s1661_s25   ;;  %s1201_s20 = sphi %s1658_s20, %s1660_s20   ;;  %s1197_s15 = sphi %s1657_s15, %s1659_s15  }
 0x2a2   : >> { %751 = vst [vmem:[%s1197_s15] sm:$0xff] %v750_v17  ;;  %v756_v21 = vld [vmem:[%s1201_s20 + $0x18] sm:$0xff]  ;;  %p783_p11 = scmp.ge.s32.totalorder %s782_s18, %s1561_s14  ;;  %v758_v24 = vld [vmem:[%s1201_s20 + $0x20] sm:$0xff]  ;;  %v760_v25 = vld [vmem:[%s1201_s20 + $0x28] sm:$0xff]  ;;  %p743_p12 = scmp.ge.s32.totalorder %s744_s17, %s1561_s14 }
 0x2a3   : >> { %753 = vst [vmem:[%s1197_s15 + $0x8] sm:$0xff] %v752_v18  ;;  %v762_v27 = vld [vmem:[%s1201_s20 + $0x30] sm:$0xff]  ;;  %v764_v29 = vld [vmem:[%s1201_s20 + $0x38] sm:$0xff]  ;;  %v766_v31 = vld [vmem:[%s1201_s20 + $0x40] sm:$0xff] }
 0x2a4   : >> { %755 = vst [vmem:[%s1197_s15 + $0x10] sm:$0xff] %v754_v19  ;;  %s1668_s18 = smov (%p783_p11, %s782_s18), 0  ;;  %v768_v32 = vld [vmem:[%s1201_s20 + $0x48] sm:$0xff]  ;;  %v770_v33 = vld [vmem:[%s1201_s20 + $0x50] sm:$0xff]  ;;  %v772_v35 = vld [vmem:[%s1201_s20 + $0x58] sm:$0xff] }
 0x2a5   : >> { %757 = vst [vmem:[%s1197_s15 + $0x18] sm:$0xff] %v756_v21  ;;  %s962_s21 = sshll.u32 %s1668_s18, 7  ;;  %v774_v36 = vld [vmem:[%s1201_s20 + $0x60] sm:$0xff]  ;;  %v776_v37 = vld [vmem:[%s1201_s20 + $0x68] sm:$0xff]  ;;  %v778_v38 = vld [vmem:[%s1201_s20 + $0x70] sm:$0xff]  ;;  %s1661_s25 = smov %s1668_s18 }
 0x2a6   : >> { %759 = vst [vmem:[%s1197_s15 + $0x20] sm:$0xff] %v758_v24  ;;  %s787_s22 = scalar_lea.vmem %s1514_s6, %s962_s21 [#allocation2]   ;;  %s788_s23 = scalar_lea.vmem %s1555_s10, %s962_s21   ;;  %v780_v39 = vld [vmem:[%s1201_s20 + $0x78] sm:$0xff] }
 0x2a7   : >> { %761 = vst [vmem:[%s1197_s15 + $0x28] sm:$0xff] %v760_v25  ;;  %s1660_s20 = smov %s787_s22 }
 0x2a8   : >> { %763 = vst [vmem:[%s1197_s15 + $0x30] sm:$0xff] %v762_v27 }
 0x2a9   : >> { %765 = vst [vmem:[%s1197_s15 + $0x38] sm:$0xff] %v764_v29 }
 0x2aa   : >> { %767 = vst [vmem:[%s1197_s15 + $0x40] sm:$0xff] %v766_v31 }
 0x2ab   : >> { %769 = vst [vmem:[%s1197_s15 + $0x48] sm:$0xff] %v768_v32 }
 0x2ac   : >> { %771 = vst [vmem:[%s1197_s15 + $0x50] sm:$0xff] %v770_v33 }
 0x2ad   : >> { %773 = vst [vmem:[%s1197_s15 + $0x58] sm:$0xff] %v772_v35  ;;  %746 = sbr.rel (!%p743_p12) target bundleno = 673 (0x2a1), region = 122 }
 0x2ae   : >> { %775 = vst [vmem:[%s1197_s15 + $0x60] sm:$0xff] %v774_v36 }
 0x2af   : >> { %777 = vst [vmem:[%s1197_s15 + $0x68] sm:$0xff] %v776_v37 }
 0x2b0   : >> { %779 = vst [vmem:[%s1197_s15 + $0x70] sm:$0xff] %v778_v38 }
 0x2b1   : >> { %781 = vst [vmem:[%s1197_s15 + $0x78] sm:$0xff] %v780_v39  ;;  %s1659_s15 = smov %s788_s23 }
 0x2b2 PF: > { %s1634_s24 = sand.u32 15, %s1666_s12   ;;  %s973_s26 = sshll.u32 %s1561_s14, 7 }
 0x2b3   : > { %s793_s27 = scalar_lea.vmem %s1514_s6, %s973_s26 [#allocation2]   ;;  %s795_s28 = scalar_lea.vmem %s1555_s10, %s973_s26  }
 0x2b4   : > { %p967_p13 = scmp.le.s32.totalorder %s1634_s24, 0 }
 0x2b5   : > { %s1211_s29 = smov (!%p967_p13), %s795_s28   ;;  %s1215_s30 = smov (!%p967_p13), %s793_s27  }
 0x2b6   : > { %886 = sbr.rel (%p967_p13) target bundleno = 707 (0x2c3), region = 127  ;;  %s1219_s4 = smov (!%p967_p13), 0  }
 0x2b7   : > { %s1223_s5 = smov (!%p967_p13), 0  }
 0x2bb LB: >> { %v805_v40 = vld [vmem:[%s1217_s30] sm:$0xff]  ;;  %s807_s12 = sadd.s32 1, %s1221_s4  ;;  %s799_s5 = sadd.s32 1, %s1225_s5   ;;  %s1225_s5 = sphi %s1223_s5, %s799_s5   ;;  %s1221_s4 = sphi %s1219_s4, %s1220_s4   ;;  %s1217_s30 = sphi %s1215_s30, %s812_s30   ;;  %s1213_s29 = sphi %s1211_s29, %s813_s29  }
 0x2bc   : >> { %806 = vst [vmem:[%s1213_s29] sm:$0xff] %v805_v40  ;;  %p808_p0 = scmp.ge.s32.totalorder %s807_s12, %s1634_s24  ;;  %p798_p1 = scmp.ge.s32.totalorder %s799_s5, %s1634_s24 }
 0x2be   : >> { %s1670_s12 = smov (%p808_p0, %s807_s12), 0  ;;  %801 = sbr.rel (!%p798_p1) target bundleno = 699 (0x2bb), region = 133 }
 0x2bf   : >> { %s968_s6 = sshll.u32 %s1670_s12, 3  ;;  %s1220_s4 = smov %s1670_s12  }
 0x2c0   : >> { %s812_s30 = scalar_lea.vmem %s793_s27, %s968_s6 [#allocation2]   ;;  %s813_s29 = scalar_lea.vmem %s795_s28, %s968_s6  }
 0x2c3 PF: > { %p10_p2 = scmp.ge.s32.totalorder %s1262_s16, 4   ;;  %s1662_s12 = smov %s1189_s13 }
 0x2c4   : > { %s1663_s13 = smov %s1270_s19  ;;  %s1664_s14 = smov %s1262_s16 }
 0x2c5   :  { %12 = sbr.rel (!%p10_p2) target bundleno = 2 (0x2), region = 144 }

</bundles_post_ra>
